<compile_context>
chip_gen: v7x
topology: tpu7x:2x2x1
jax: 0.10.0
libtpu: 0.0.40
codegen_flags: <defaults>
</compile_context>

<pallas_src>
import jax
import jax.numpy as jnp
from jax.experimental import pallas as pl
from jax.experimental.pallas import tpu as pltpu

NUM_JOINTS = 16
K_IN = NUM_JOINTS * 2
HIDDEN = 100
HIDDEN_PAD = 128          # hidden width padded to a full 128-lane / sublane tile
NEG_SLOPE = 0.01          # nn.LeakyReLU() default negative slope


def _leaky_relu(v):
    return jnp.where(v > 0, v, NEG_SLOPE * v)


def _disc_kernel(xT_ref,
                 w1T_ref, b1_ref,
                 w2T_ref, b2_ref,
                 w3T_ref, b3_ref,
                 w45T_ref, b45_ref,
                 w6T_ref, b6_ref,
                 out_ref):
    # Feature-major: activations are (HIDDEN_PAD, tile_b).  Matmuls are
    # bf16 x bf16 -> f32 on the MXU; bias adds, residual and LeakyReLU stay in
    # f32 on the VPU; each activation is cast to bf16 exactly once.
    xT = xT_ref[...]                                          # (K_IN, tile_b) bf16

    a1 = jnp.dot(w1T_ref[...], xT,
                 preferred_element_type=jnp.float32) + b1_ref[...]
    d1 = _leaky_relu(a1).astype(jnp.bfloat16)                 # (128, tile_b) bf16

    a2 = jnp.dot(w2T_ref[...], d1,
                 preferred_element_type=jnp.float32) + b2_ref[...]
    d2 = _leaky_relu(a2).astype(jnp.bfloat16)

    a3 = (jnp.dot(w3T_ref[...], d2,
                  preferred_element_type=jnp.float32)
          + b3_ref[...] + d1.astype(jnp.float32))             # residual (+ d1)
    d3 = _leaky_relu(a3).astype(jnp.bfloat16)

    # Layers 4 + 5 were folded into (w45, b45) in the wrapper (no activation
    # between them in the original module), so this is exact math.
    a45 = jnp.dot(w45T_ref[...], d3,
                  preferred_element_type=jnp.float32) + b45_ref[...]
    d45 = _leaky_relu(a45).astype(jnp.bfloat16)

    # Final layer as a tiny-M GEMM: (8, 128) @ (128, tile_b); only row 0 of the
    # padded w6^T is real.  Output store is a lane-dense (1, tile_b) slab.
    d_out = jnp.dot(w6T_ref[...], d45,
                    preferred_element_type=jnp.float32)       # (8, tile_b)
    out_ref[...] = d_out[0:1, :] + b6_ref[...]                # (1, tile_b)


def init_params(key, num_joints=NUM_JOINTS, hidden=HIDDEN):
    """Deterministic synthetic parameters, stored as (in, out) weights and (1, out) biases."""
    dims = [(num_joints * 2, hidden),  # pose_layer_1
            (hidden, hidden),          # pose_layer_2
            (hidden, hidden),          # pose_layer_3
            (hidden, hidden),          # pose_layer_4
            (hidden, hidden),          # layer_last
            (hidden, 1)]               # layer_pred
    params = []
    for i, (fan_in, fan_out) in enumerate(dims):
        kw, kb, key = jax.random.split(jax.random.fold_in(key, i), 3)
        bound = 1.0 / jnp.sqrt(jnp.float32(fan_in))
        w = jax.random.uniform(kw, (fan_in, fan_out), jnp.float32, -bound, bound)
        b = jax.random.uniform(kb, (1, fan_out), jnp.float32, -bound, bound)
        params.append((w, b))
    return params


def _pad_to(a, shape):
    return jnp.pad(a, [(0, t - s) for s, t in zip(a.shape, shape)])


def _prepare_params(params):
    """Fold L4->L5, transpose to feature-major, pad hidden 100 -> 128, cast weights to bf16."""
    (w1, b1), (w2, b2), (w3, b3), (w4, b4), (w5, b5), (w6, b6) = params
    # d_last = lrelu((d3 @ w4 + b4) @ w5 + b5) = lrelu(d3 @ (w4 @ w5) + (b4 @ w5 + b5))
    w45 = w4 @ w5
    b45 = b4 @ w5 + b5

    w1T = _pad_to(w1.T, (HIDDEN_PAD, K_IN)).astype(jnp.bfloat16)
    w2T = _pad_to(w2.T, (HIDDEN_PAD, HIDDEN_PAD)).astype(jnp.bfloat16)
    w3T = _pad_to(w3.T, (HIDDEN_PAD, HIDDEN_PAD)).astype(jnp.bfloat16)
    w45T = _pad_to(w45.T, (HIDDEN_PAD, HIDDEN_PAD)).astype(jnp.bfloat16)
    w6T = _pad_to(w6.T, (8, HIDDEN_PAD)).astype(jnp.bfloat16)     # only row 0 real

    b1T = _pad_to(b1.T, (HIDDEN_PAD, 1)).astype(jnp.float32)
    b2T = _pad_to(b2.T, (HIDDEN_PAD, 1)).astype(jnp.float32)
    b3T = _pad_to(b3.T, (HIDDEN_PAD, 1)).astype(jnp.float32)
    b45T = _pad_to(b45.T, (HIDDEN_PAD, 1)).astype(jnp.float32)
    b6T = b6.astype(jnp.float32)                                   # (1, 1)

    return [w1T, b1T, w2T, b2T, w3T, b3T, w45T, b45T, w6T, b6T]


def _round_up(x, m):
    return ((x + m - 1) // m) * m


def pos2d_discriminator(x, params, *, tile_b=None):
    """x: (B, num_joints, 2) or (B, num_joints*2) -> (B, 1) float32."""
    B = x.shape[0]
    x_flat = x.reshape(B, -1)
    assert x_flat.shape[1] == K_IN

    if tile_b is None:
        if B >= 4096:
            tile_b = 2048   # amortizes grid-step overhead; fits v7x's 64 MiB VMEM easily
        else:
            # >= 2 grid steps whenever B allows, so "parallel" can shard across
            # both v7x TensorCores; lane-aligned to 256.
            tile_b = max(256, _round_up(-(-B // 2), 256))
    assert tile_b % 128 == 0
    b_pad = _round_up(B, tile_b)

    # Single fused pre-pass: transpose to (K, B), cast to bf16, pad batch (lanes).
    xT = x_flat.T.astype(jnp.bfloat16)
    if b_pad != B:
        xT = jnp.pad(xT, ((0, 0), (0, b_pad - B)))

    flat_params = _prepare_params(params)

    const_map = lambda i: (0, 0)
    in_specs = [pl.BlockSpec((K_IN, tile_b), lambda i: (0, i))]
    in_specs += [pl.BlockSpec(p.shape, const_map) for p in flat_params]

    out = pl.pallas_call(
        _disc_kernel,
        out_shape=jax.ShapeDtypeStruct((1, b_pad), jnp.float32),
        grid=(b_pad // tile_b,),
        in_specs=in_specs,
        out_specs=pl.BlockSpec((1, tile_b), lambda i: (0, i)),
        compiler_params=pltpu.CompilerParams(
            dimension_semantics=("parallel",)),
    )(xT, *flat_params)

    # (1, b_pad) lane-dense result -> (B, 1).
    return out[0, :B].reshape(B, 1)


def _reference(x, params):
    """Exact f32 math of the original PyTorch module (no folding, no padding)."""
    B = x.shape[0]
    h = x.reshape(B, -1).astype(jnp.float32)
    (w1, b1), (w2, b2), (w3, b3), (w4, b4), (w5, b5), (w6, b6) = params
    lr = lambda v: jnp.where(v > 0, v, NEG_SLOPE * v)
    d1 = lr(h @ w1 + b1)
    d2 = lr(d1 @ w2 + b2)
    d3 = lr(d2 @ w3 + b3 + d1)
    d4 = d3 @ w4 + b4
    d_last = lr(d4 @ w5 + b5)
    return d_last @ w6 + b6


if __name__ == "__main__":
    key = jax.random.PRNGKey(0)
    k_x, k_p = jax.random.split(key)

    B = 8
    x = jax.random.normal(k_x, (B, NUM_JOINTS, 2), jnp.float32)
    params = init_params(k_p)

    out = pos2d_discriminator(x, params)
    out = jax.block_until_ready(out)

    ref = _reference(x, params)
    assert out.shape == (B, 1), out.shape
    # bf16 matmul operands (f32 accumulation) + L4/L5 fold -> relaxed tolerance.
    assert jnp.allclose(out, ref, atol=5e-2, rtol=5e-2), (out, ref)

    print("KERNEL_OK")
</pallas_src>

<mosaic_0001>
module attributes {stable_mosaic.version = 11 : i64} {
  func.func @_disc_kernel(%arg0: i32, %arg1: memref<32x256xbf16, #tpu.memory_space<vmem>>, %arg2: memref<128x32xbf16, #tpu.memory_space<vmem>>, %arg3: memref<128x1xf32, #tpu.memory_space<vmem>>, %arg4: memref<128x128xbf16, #tpu.memory_space<vmem>>, %arg5: memref<128x1xf32, #tpu.memory_space<vmem>>, %arg6: memref<128x128xbf16, #tpu.memory_space<vmem>>, %arg7: memref<128x1xf32, #tpu.memory_space<vmem>>, %arg8: memref<128x128xbf16, #tpu.memory_space<vmem>>, %arg9: memref<128x1xf32, #tpu.memory_space<vmem>>, %arg10: memref<8x128xbf16, #tpu.memory_space<vmem>>, %arg11: memref<1x1xf32, #tpu.memory_space<vmem>>, %arg12: memref<1x256xf32, #tpu.memory_space<vmem>>) attributes {dimension_semantics = [#tpu.dimension_semantics<parallel>], iteration_bounds = array<i64: 1>, scalar_prefetch = 0 : i64, scratch_operands = 0 : i64, tpu.core_type = #tpu.core_type<tc>, window_params = [{transform_indices = @transform_0, window_bounds = array<i64: 32, 256>}, {pipeline_mode = #tpu.pipeline_mode<synchronous>, transform_indices = @transform_1, window_bounds = array<i64: 128, 32>}, {pipeline_mode = #tpu.pipeline_mode<synchronous>, transform_indices = @transform_2, window_bounds = array<i64: 128, 1>}, {pipeline_mode = #tpu.pipeline_mode<synchronous>, transform_indices = @transform_3, window_bounds = array<i64: 128, 128>}, {pipeline_mode = #tpu.pipeline_mode<synchronous>, transform_indices = @transform_4, window_bounds = array<i64: 128, 1>}, {pipeline_mode = #tpu.pipeline_mode<synchronous>, transform_indices = @transform_5, window_bounds = array<i64: 128, 128>}, {pipeline_mode = #tpu.pipeline_mode<synchronous>, transform_indices = @transform_6, window_bounds = array<i64: 128, 1>}, {pipeline_mode = #tpu.pipeline_mode<synchronous>, transform_indices = @transform_7, window_bounds = array<i64: 128, 128>}, {pipeline_mode = #tpu.pipeline_mode<synchronous>, transform_indices = @transform_8, window_bounds = array<i64: 128, 1>}, {pipeline_mode = #tpu.pipeline_mode<synchronous>, transform_indices = @transform_9, window_bounds = array<i64: 8, 128>}, {pipeline_mode = #tpu.pipeline_mode<synchronous>, transform_indices = @transform_10, window_bounds = array<i64: 1, 1>}, {transform_indices = @transform_11, window_bounds = array<i64: 1, 256>}]} {
    %c0 = arith.constant 0 : index
    %c0_0 = arith.constant 0 : index
    %0 = vector.load %arg1[%c0, %c0_0] : memref<32x256xbf16, #tpu.memory_space<vmem>>, vector<32x256xbf16>
    %c0_1 = arith.constant 0 : index
    %c0_2 = arith.constant 0 : index
    %1 = vector.load %arg2[%c0_1, %c0_2] : memref<128x32xbf16, #tpu.memory_space<vmem>>, vector<128x32xbf16>
    %cst = arith.constant dense<0.000000e+00> : vector<128x256xf32>
    %2 = tpu.matmul %1, %0, %cst {dimension_numbers = #tpu.dot_dimension_numbers<[1], [0], [0], [1], [0, 0, 1, 1], [], []>} : vector<128x32xbf16>, vector<32x256xbf16>, vector<128x256xf32> -> vector<128x256xf32>
    %c0_3 = arith.constant 0 : index
    %c0_4 = arith.constant 0 : index
    %3 = vector.load %arg3[%c0_3, %c0_4] : memref<128x1xf32, #tpu.memory_space<vmem>>, vector<128x1xf32>
    %4 = vector.broadcast %3 : vector<128x1xf32> to vector<128x256xf32>
    %5 = arith.addf %2, %4 : vector<128x256xf32>
    %cst_5 = arith.constant 0.000000e+00 : f32
    %6 = vector.broadcast %cst_5 : f32 to vector<128x256xf32>
    %7 = arith.cmpf ogt, %5, %6 : vector<128x256xf32>
    %cst_6 = arith.constant 0.00999999977 : f32
    %8 = vector.broadcast %cst_6 : f32 to vector<128x256xf32>
    %9 = arith.mulf %8, %5 : vector<128x256xf32>
    %10 = arith.select %7, %5, %9 : vector<128x256xi1>, vector<128x256xf32>
    %11 = arith.truncf %10 : vector<128x256xf32> to vector<128x256xbf16>
    %c0_7 = arith.constant 0 : index
    %c0_8 = arith.constant 0 : index
    %12 = vector.load %arg4[%c0_7, %c0_8] : memref<128x128xbf16, #tpu.memory_space<vmem>>, vector<128x128xbf16>
    %cst_9 = arith.constant dense<0.000000e+00> : vector<128x256xf32>
    %13 = tpu.matmul %12, %11, %cst_9 {dimension_numbers = #tpu.dot_dimension_numbers<[1], [0], [0], [1], [0, 0, 1, 1], [], []>} : vector<128x128xbf16>, vector<128x256xbf16>, vector<128x256xf32> -> vector<128x256xf32>
    %c0_10 = arith.constant 0 : index
    %c0_11 = arith.constant 0 : index
    %14 = vector.load %arg5[%c0_10, %c0_11] : memref<128x1xf32, #tpu.memory_space<vmem>>, vector<128x1xf32>
    %15 = vector.broadcast %14 : vector<128x1xf32> to vector<128x256xf32>
    %16 = arith.addf %13, %15 : vector<128x256xf32>
    %cst_12 = arith.constant 0.000000e+00 : f32
    %17 = vector.broadcast %cst_12 : f32 to vector<128x256xf32>
    %18 = arith.cmpf ogt, %16, %17 : vector<128x256xf32>
    %cst_13 = arith.constant 0.00999999977 : f32
    %19 = vector.broadcast %cst_13 : f32 to vector<128x256xf32>
    %20 = arith.mulf %19, %16 : vector<128x256xf32>
    %21 = arith.select %18, %16, %20 : vector<128x256xi1>, vector<128x256xf32>
    %22 = arith.truncf %21 : vector<128x256xf32> to vector<128x256xbf16>
    %c0_14 = arith.constant 0 : index
    %c0_15 = arith.constant 0 : index
    %23 = vector.load %arg6[%c0_14, %c0_15] : memref<128x128xbf16, #tpu.memory_space<vmem>>, vector<128x128xbf16>
    %cst_16 = arith.constant dense<0.000000e+00> : vector<128x256xf32>
    %24 = tpu.matmul %23, %22, %cst_16 {dimension_numbers = #tpu.dot_dimension_numbers<[1], [0], [0], [1], [0, 0, 1, 1], [], []>} : vector<128x128xbf16>, vector<128x256xbf16>, vector<128x256xf32> -> vector<128x256xf32>
    %c0_17 = arith.constant 0 : index
    %c0_18 = arith.constant 0 : index
    %25 = vector.load %arg7[%c0_17, %c0_18] : memref<128x1xf32, #tpu.memory_space<vmem>>, vector<128x1xf32>
    %26 = vector.broadcast %25 : vector<128x1xf32> to vector<128x256xf32>
    %27 = arith.addf %24, %26 : vector<128x256xf32>
    %28 = arith.extf %11 : vector<128x256xbf16> to vector<128x256xf32>
    %29 = arith.addf %27, %28 : vector<128x256xf32>
    %cst_19 = arith.constant 0.000000e+00 : f32
    %30 = vector.broadcast %cst_19 : f32 to vector<128x256xf32>
    %31 = arith.cmpf ogt, %29, %30 : vector<128x256xf32>
    %cst_20 = arith.constant 0.00999999977 : f32
    %32 = vector.broadcast %cst_20 : f32 to vector<128x256xf32>
    %33 = arith.mulf %32, %29 : vector<128x256xf32>
    %34 = arith.select %31, %29, %33 : vector<128x256xi1>, vector<128x256xf32>
    %35 = arith.truncf %34 : vector<128x256xf32> to vector<128x256xbf16>
    %c0_21 = arith.constant 0 : index
    %c0_22 = arith.constant 0 : index
    %36 = vector.load %arg8[%c0_21, %c0_22] : memref<128x128xbf16, #tpu.memory_space<vmem>>, vector<128x128xbf16>
    %cst_23 = arith.constant dense<0.000000e+00> : vector<128x256xf32>
    %37 = tpu.matmul %36, %35, %cst_23 {dimension_numbers = #tpu.dot_dimension_numbers<[1], [0], [0], [1], [0, 0, 1, 1], [], []>} : vector<128x128xbf16>, vector<128x256xbf16>, vector<128x256xf32> -> vector<128x256xf32>
    %c0_24 = arith.constant 0 : index
    %c0_25 = arith.constant 0 : index
    %38 = vector.load %arg9[%c0_24, %c0_25] : memref<128x1xf32, #tpu.memory_space<vmem>>, vector<128x1xf32>
    %39 = vector.broadcast %38 : vector<128x1xf32> to vector<128x256xf32>
    %40 = arith.addf %37, %39 : vector<128x256xf32>
    %cst_26 = arith.constant 0.000000e+00 : f32
    %41 = vector.broadcast %cst_26 : f32 to vector<128x256xf32>
    %42 = arith.cmpf ogt, %40, %41 : vector<128x256xf32>
    %cst_27 = arith.constant 0.00999999977 : f32
    %43 = vector.broadcast %cst_27 : f32 to vector<128x256xf32>
    %44 = arith.mulf %43, %40 : vector<128x256xf32>
    %45 = arith.select %42, %40, %44 : vector<128x256xi1>, vector<128x256xf32>
    %46 = arith.truncf %45 : vector<128x256xf32> to vector<128x256xbf16>
    %c0_28 = arith.constant 0 : index
    %c0_29 = arith.constant 0 : index
    %47 = vector.load %arg10[%c0_28, %c0_29] : memref<8x128xbf16, #tpu.memory_space<vmem>>, vector<8x128xbf16>
    %cst_30 = arith.constant dense<0.000000e+00> : vector<8x256xf32>
    %48 = tpu.matmul %47, %46, %cst_30 {dimension_numbers = #tpu.dot_dimension_numbers<[1], [0], [0], [1], [0, 0, 1, 1], [], []>} : vector<8x128xbf16>, vector<128x256xbf16>, vector<8x256xf32> -> vector<8x256xf32>
    %49 = vector.extract_strided_slice %48 {offsets = [0, 0], sizes = [1, 256], strides = [1, 1]} : vector<8x256xf32> to vector<1x256xf32>
    %c0_31 = arith.constant 0 : index
    %c0_32 = arith.constant 0 : index
    %50 = vector.load %arg11[%c0_31, %c0_32] : memref<1x1xf32, #tpu.memory_space<vmem>>, vector<1x1xf32>
    %51 = vector.broadcast %50 : vector<1x1xf32> to vector<1x256xf32>
    %52 = arith.addf %49, %51 : vector<1x256xf32>
    %c0_33 = arith.constant 0 : index
    %c0_34 = arith.constant 0 : index
    %53 = vector.load %arg12[%c0_33, %c0_34] : memref<1x256xf32, #tpu.memory_space<vmem>>, vector<1x256xf32>
    tpu.vector_store %arg12[%c0_33, %c0_34], %52 {strides = array<i32>} : memref<1x256xf32, #tpu.memory_space<vmem>>, vector<1x256xf32>,
    return
  }
  func.func @transform_0(%arg0: i32) -> (i32, i32) {
    %c0_i32 = arith.constant 0 : i32
    %c0_i32_0 = arith.constant 0 : i32
    return %c0_i32, %arg0 : i32, i32
  }
  func.func @transform_1(%arg0: i32) -> (i32, i32) {
    %c0_i32 = arith.constant 0 : i32
    %c0_i32_0 = arith.constant 0 : i32
    %c0_i32_1 = arith.constant 0 : i32
    return %c0_i32, %c0_i32_0 : i32, i32
  }
  func.func @transform_2(%arg0: i32) -> (i32, i32) {
    %c0_i32 = arith.constant 0 : i32
    %c0_i32_0 = arith.constant 0 : i32
    %c0_i32_1 = arith.constant 0 : i32
    return %c0_i32, %c0_i32_0 : i32, i32
  }
  func.func @transform_3(%arg0: i32) -> (i32, i32) {
    %c0_i32 = arith.constant 0 : i32
    %c0_i32_0 = arith.constant 0 : i32
    %c0_i32_1 = arith.constant 0 : i32
    return %c0_i32, %c0_i32_0 : i32, i32
  }
  func.func @transform_4(%arg0: i32) -> (i32, i32) {
    %c0_i32 = arith.constant 0 : i32
    %c0_i32_0 = arith.constant 0 : i32
    %c0_i32_1 = arith.constant 0 : i32
    return %c0_i32, %c0_i32_0 : i32, i32
  }
  func.func @transform_5(%arg0: i32) -> (i32, i32) {
    %c0_i32 = arith.constant 0 : i32
    %c0_i32_0 = arith.constant 0 : i32
    %c0_i32_1 = arith.constant 0 : i32
    return %c0_i32, %c0_i32_0 : i32, i32
  }
  func.func @transform_6(%arg0: i32) -> (i32, i32) {
    %c0_i32 = arith.constant 0 : i32
    %c0_i32_0 = arith.constant 0 : i32
    %c0_i32_1 = arith.constant 0 : i32
    return %c0_i32, %c0_i32_0 : i32, i32
  }
  func.func @transform_7(%arg0: i32) -> (i32, i32) {
    %c0_i32 = arith.constant 0 : i32
    %c0_i32_0 = arith.constant 0 : i32
    %c0_i32_1 = arith.constant 0 : i32
    return %c0_i32, %c0_i32_0 : i32, i32
  }
  func.func @transform_8(%arg0: i32) -> (i32, i32) {
    %c0_i32 = arith.constant 0 : i32
    %c0_i32_0 = arith.constant 0 : i32
    %c0_i32_1 = arith.constant 0 : i32
    return %c0_i32, %c0_i32_0 : i32, i32
  }
  func.func @transform_9(%arg0: i32) -> (i32, i32) {
    %c0_i32 = arith.constant 0 : i32
    %c0_i32_0 = arith.constant 0 : i32
    %c0_i32_1 = arith.constant 0 : i32
    return %c0_i32, %c0_i32_0 : i32, i32
  }
  func.func @transform_10(%arg0: i32) -> (i32, i32) {
    %c0_i32 = arith.constant 0 : i32
    %c0_i32_0 = arith.constant 0 : i32
    %c0_i32_1 = arith.constant 0 : i32
    return %c0_i32, %c0_i32_0 : i32, i32
  }
  func.func @transform_11(%arg0: i32) -> (i32, i32) {
    %c0_i32 = arith.constant 0 : i32
    %c0_i32_0 = arith.constant 0 : i32
    return %c0_i32, %arg0 : i32, i32
  }
}

</mosaic_0001>

<bundles_post_ra>
// kernel: tpu_custom_call.1
= control target key start
LH: loop header
LB: loop body
LE: loop exit
PB: predicated region body
PF: predicated region fallthrough
CT: control target
= control target key end

     0   :  { %s2400_s0 = inlined_call_operand.vmem [shape: bf16[32,256], index: 0, kind: input, shape index: {}]   ;;  %s2401_s1 = inlined_call_operand.vmem [shape: bf16[128,32], index: 1, kind: input, shape index: {}]   ;;  %s2402_s2 = inlined_call_operand.vmem [shape: f32[128,1], index: 2, kind: input, shape index: {}]   ;;  %s2403_s3 = inlined_call_operand.vmem [shape: bf16[128,128], index: 3, kind: input, shape index: {}]   ;;  %s2404_s4 = inlined_call_operand.vmem [shape: f32[128,1], index: 4, kind: input, shape index: {}]   ;;  %s2405_s5 = inlined_call_operand.vmem [shape: bf16[128,128], index: 5, kind: input, shape index: {}]   ;;  %s2406_s6 = inlined_call_operand.vmem [shape: f32[128,1], index: 6, kind: input, shape index: {}]   ;;  %s2407_s7 = inlined_call_operand.vmem [shape: bf16[128,128], index: 7, kind: input, shape index: {}]   ;;  %s2408_s8 = inlined_call_operand.vmem [shape: f32[128,1], index: 8, kind: input, shape index: {}]   ;;  %s2409_s9 = inlined_call_operand.vmem [shape: bf16[8,128], index: 9, kind: input, shape index: {}]   ;;  %s2410_s10 = inlined_call_operand.<no memory space> [shape: f32[1,1], index: 10, kind: input, shape index: {}]   ;;  %s2411_s11 = inlined_call_operand.hbm [shape: f32[1,256], index: 11, kind: output, shape index: {}]  }
   0x1   :  { %v16_v0 = vstv %s2410_s10 }
   0x2   :  { %17 = vst [vmem:[#allocation2] sm:$0x1] %v16_v0 }
   0x3   :  { %v64_v1 = vld [vmem:[%s2402_s2 + $0x10] sm:$0xff]  ;;  %v62_v2 = vld [vmem:[%s2402_s2] sm:$0xff]  ;;  %v1889_v3 = vmov 0   ;;  %v65_v6 = vld [vmem:[%s2402_s2 + $0x18] sm:$0xff]  ;;  %vm218_vm0 = vcmask 261120  }
   0x4   :  { %1826 = vset.pattern.permute.xlu1 %v1889_v3  ;;  %1825 = vset.pattern.permute.xlu0 %v1889_v3  ;;  %v1827_v4 = vld [vmem:[%s2400_s0 + $0x4] ss:$8 sps:$4 sm:$0xff]   ;;  %v1829_v5 = vld [vmem:[%s2400_s0] ss:$8 sps:$4 sm:$0xff]   ;;  %v1830_v8 = vld [vmem:[%s2400_s0 + $0x14] ss:$8 sps:$4 sm:$0xff]  }
   0x5   :  { %90 = vperm.xlu1 %1826, %v64_v1   ;;  %80 = vperm.xlu0 %1825, %v62_v2   ;;  %v63_v7 = vld [vmem:[%s2402_s2 + $0x8] sm:$0xff]  ;;  %v1832_v9 = vld [vmem:[%s2400_s0 + $0x10] ss:$8 sps:$4 sm:$0xff]   ;;  %v66_v11 = vld [vmem:[%s2402_s2 + $0x20] sm:$0xff] }
   0x6   :  { %243 = vmatprep.subr.bf16.mxu0 %v1827_v4  ;;  %275 = vmatprep.mubr.bf16.mxu0 %v1889_v3  ;;  %v67_v10 = vld [vmem:[%s2402_s2 + $0x28] sm:$0xff]  ;;  %v1833_v12 = vld [vmem:[%s2401_s1] sm:$0xff]   ;;  %v69_v13 = vld [vmem:[%s2402_s2 + $0x38] sm:$0xff] }
   0x7   :  { %244 = vmatpush1.bf16.msra.mxu0 %v1829_v5  ;;  %660 = vmatprep.mubr.bf16.mxu1 %v1889_v3  ;;  %v68_v14 = vld [vmem:[%s2402_s2 + $0x30] sm:$0xff]  ;;  %v71_v15 = vld [vmem:[%s2402_s2 + $0x48] sm:$0xff]  ;;  %v70_v16 = vld [vmem:[%s2402_s2 + $0x40] sm:$0xff] }
   0x8   :  { %245 = vmatprep.subr.bf16.mxu0 %v1830_v8  ;;  %v1834_v17 = vld [vmem:[%s2401_s1 + $0x8] sm:$0xff]   ;;  %v73_v18 = vld [vmem:[%s2402_s2 + $0x58] sm:$0xff]  ;;  %v72_v19 = vld [vmem:[%s2402_s2 + $0x50] sm:$0xff] }
   0x9   :  { %95 = vperm.xlu1 %1826, %v65_v6   ;;  %85 = vperm.xlu0 %1825, %v63_v7   ;;  %v75_v20 = vld [vmem:[%s2402_s2 + $0x68] sm:$0xff]  ;;  %v74_v21 = vld [vmem:[%s2402_s2 + $0x60] sm:$0xff]  ;;  %v1835_v22 = vld [vmem:[%s2401_s1 + $0x10] sm:$0xff]  }
   0xa   :  { %v77_v23 = vld [vmem:[%s2402_s2 + $0x78] sm:$0xff]  ;;  %v76_v24 = vld [vmem:[%s2402_s2 + $0x70] sm:$0xff]  ;;  %v485_v25 = vld [vmem:[%s2404_s4 + $0x8] sm:$0xff] }
   0xb   :  { %246 = vmatpush1.bf16.msra.mxu0 %v1832_v9  ;;  %v484_v26 = vld [vmem:[%s2404_s4] sm:$0xff]  ;;  %v1836_v27 = vld [vmem:[%s2401_s1 + $0x18] sm:$0xff]   ;;  %v486_v29 = vld [vmem:[%s2404_s4 + $0x10] sm:$0xff] }
   0xc   :  { %v487_v28 = vld [vmem:[%s2404_s4 + $0x18] sm:$0xff]  ;;  %v489_v30 = vld [vmem:[%s2404_s4 + $0x28] sm:$0xff]  ;;  %v488_v31 = vld [vmem:[%s2404_s4 + $0x20] sm:$0xff] }
   0xd   :  { %105 = vperm.xlu1 %1826, %v67_v10   ;;  %100 = vperm.xlu0 %1825, %v66_v11   ;;  %v1837_v32 = vld [vmem:[%s2401_s1 + $0x20] sm:$0xff]   ;;  %v491_v33 = vld [vmem:[%s2404_s4 + $0x38] sm:$0xff]  ;;  %v490_v34 = vld [vmem:[%s2404_s4 + $0x30] sm:$0xff] }
   0xe   :  { %1790 = vmatmul.mubr.msk.bf16.vlgmr.msra.gmra.mrb[0].mxu0 %vm218_vm0, %v1833_v12  ;;  %v493_v35 = vld [vmem:[%s2404_s4 + $0x48] sm:$0xff]  ;;  %v492_v36 = vld [vmem:[%s2404_s4 + $0x40] sm:$0xff] }
   0xf   :  { %285 = vmatprep.mubr.bf16.mxu0 %v1889_v3  ;;  %v1838_v37 = vld [vmem:[%s2401_s1 + $0x28] sm:$0xff]  }
  0x11   :  { %115 = vperm.xlu1 %1826, %v69_v13   ;;  %110 = vperm.xlu0 %1825, %v68_v14  }
  0x15   :  { %125 = vperm.xlu1 %1826, %v71_v15   ;;  %120 = vperm.xlu0 %1825, %v70_v16  }
  0x16   :  { %1791 = vmatmul.mubr.msk.bf16.gmra.mrb[4].mxu0 %vm218_vm0, %v1834_v17 }
  0x17   :  { %295 = vmatprep.mubr.bf16.mxu0 %v1889_v3 }
  0x19   :  { %135 = vperm.xlu1 %1826, %v73_v18   ;;  %130 = vperm.xlu0 %1825, %v72_v19  }
  0x1d   :  { %145 = vperm.xlu1 %1826, %v75_v20   ;;  %140 = vperm.xlu0 %1825, %v74_v21  }
  0x1e   :  { %1792 = vmatmul.mubr.msk.bf16.gmra.mrb[8].mxu0 %vm218_vm0, %v1835_v22 }
  0x1f   :  { %305 = vmatprep.mubr.bf16.mxu0 %v1889_v3 }
  0x21   :  { %155 = vperm.xlu1 %1826, %v77_v23   ;;  %150 = vperm.xlu0 %1825, %v76_v24  }
  0x25   :  { %507 = vperm.xlu1 %1826, %v485_v25   ;;  %502 = vperm.xlu0 %1825, %v484_v26  }
  0x26   :  { %1793 = vmatmul.mubr.msk.bf16.gmra.mrb[12].mxu0 %vm218_vm0, %v1836_v27 }
  0x27   :  { %315 = vmatprep.mubr.bf16.mxu0 %v1889_v3 }
  0x29   :  { %517 = vperm.xlu1 %1826, %v487_v28   ;;  %512 = vperm.xlu0 %1825, %v486_v29  }
  0x2d   :  { %527 = vperm.xlu1 %1826, %v489_v30   ;;  %522 = vperm.xlu0 %1825, %v488_v31  }
  0x2e   :  { %1794 = vmatmul.mubr.msk.bf16.gmra.mrb[16].mxu0 %vm218_vm0, %v1837_v32 }
  0x2f   :  { %325 = vmatprep.mubr.bf16.mxu0 %v1889_v3 }
  0x31   :  { %537 = vperm.xlu1 %1826, %v491_v33   ;;  %532 = vperm.xlu0 %1825, %v490_v34  }
  0x32   :  { %18 = vsyncpa [#allocation4], 0  ;;  %v495_v38 = vld [vmem:[%s2404_s4 + $0x58] sm:$0xff]  ;;  %v494_v39 = vld [vmem:[%s2404_s4 + $0x50] sm:$0xff]  ;;  %s1891_s28 = smov [#allocation3]  }
  0x33   :  { %v497_v40 = vld [vmem:[%s2404_s4 + $0x68] sm:$0xff]  ;;  %v496_v41 = vld [vmem:[%s2404_s4 + $0x60] sm:$0xff]  ;;  %v1839_v42 = vld [vmem:[%s2401_s1 + $0x30] sm:$0xff]  }
  0x34   :  { %v499_v43 = vld [vmem:[%s2404_s4 + $0x78] sm:$0xff]  ;;  %v498_v44 = vld [vmem:[%s2404_s4 + $0x70] sm:$0xff]  ;;  %v870_v45 = vld [vmem:[%s2406_s6 + $0x8] sm:$0xff] }
  0x35   :  { %547 = vperm.xlu1 %1826, %v493_v35   ;;  %542 = vperm.xlu0 %1825, %v492_v36   ;;  %v869_v46 = vld [vmem:[%s2406_s6] sm:$0xff]  ;;  %v1840_v47 = vld [vmem:[%s2401_s1 + $0x38] sm:$0xff]   ;;  %v871_v49 = vld [vmem:[%s2406_s6 + $0x10] sm:$0xff]  ;;  %s1770_s1 = sshll.u32 %s1891_s28, 4  ;;  %s1771_s1 = int_to_ptr.vmem [resolvable:$true] %s1770_s1 }
  0x36   :  { %1795 = vmatmul.mubr.msk.bf16.gmra.mrb[20].mxu0 %vm218_vm0, %v1838_v37  ;;  %v872_v48 = vld [vmem:[%s2406_s6 + $0x18] sm:$0xff]  ;;  %v874_v50 = vld [vmem:[%s2406_s6 + $0x28] sm:$0xff]  ;;  %v873_v51 = vld [vmem:[%s2406_s6 + $0x20] sm:$0xff]  ;;  %p1870_p1 = scmp.lt.s32.totalorder %s1771_s1, %s1771_s1 }
  0x37   :  { %335 = vmatprep.mubr.bf16.mxu0 %v1889_v3  ;;  %v876_v52 = vld [vmem:[%s2406_s6 + $0x38] sm:$0xff]  ;;  %v875_v53 = vld [vmem:[%s2406_s6 + $0x30] sm:$0xff]  ;;  %v878_v54 = vld [vmem:[%s2406_s6 + $0x48] sm:$0xff] }
  0x38   :  { %v877_v55 = vld [vmem:[%s2406_s6 + $0x40] sm:$0xff]  ;;  %v880_v56 = vld [vmem:[%s2406_s6 + $0x58] sm:$0xff]  ;;  %v879_v57 = vld [vmem:[%s2406_s6 + $0x50] sm:$0xff] }
  0x39   :  { %557 = vperm.xlu1 %1826, %v495_v38   ;;  %552 = vperm.xlu0 %1825, %v494_v39   ;;  %v882_v58 = vld [vmem:[%s2406_s6 + $0x68] sm:$0xff]  ;;  %v881_v59 = vld [vmem:[%s2406_s6 + $0x60] sm:$0xff]  ;;  %v884_v60 = vld [vmem:[%s2406_s6 + $0x78] sm:$0xff] }
  0x3a   :  { %v883_v61 = vld [vmem:[%s2406_s6 + $0x70] sm:$0xff]  ;;  %v1319_v62 = vld [vmem:[%s2408_s8 + $0x8] sm:$0xff]  ;;  %v1318_v63 = vld [vmem:[%s2408_s8] sm:$0xff] }
  0x3b   :  { %v1321_v0 = vld [vmem:[%s2408_s8 + $0x18] sm:$0xff]  ;;  %v1320_v1 = vld [vmem:[%s2408_s8 + $0x10] sm:$0xff]  ;;  %v1323_v2 = vld [vmem:[%s2408_s8 + $0x28] sm:$0xff] }
  0x3c   :  { %v1322_v4 = vld [vmem:[%s2408_s8 + $0x20] sm:$0xff]  ;;  %v1325_v5 = vld [vmem:[%s2408_s8 + $0x38] sm:$0xff]  ;;  %v1324_v6 = vld [vmem:[%s2408_s8 + $0x30] sm:$0xff] }
  0x3d   :  { %567 = vperm.xlu1 %1826, %v497_v40   ;;  %562 = vperm.xlu0 %1825, %v496_v41   ;;  %v1327_v7 = vld [vmem:[%s2408_s8 + $0x48] sm:$0xff]  ;;  %v1326_v8 = vld [vmem:[%s2408_s8 + $0x40] sm:$0xff]  ;;  %v1329_v9 = vld [vmem:[%s2408_s8 + $0x58] sm:$0xff] }
  0x3e   :  { %1796 = vmatmul.mubr.msk.bf16.gmra.mrb[24].mxu0 %vm218_vm0, %v1839_v42  ;;  %v1328_v10 = vld [vmem:[%s2408_s8 + $0x50] sm:$0xff]  ;;  %v1331_v11 = vld [vmem:[%s2408_s8 + $0x68] sm:$0xff]  ;;  %v1330_v12 = vld [vmem:[%s2408_s8 + $0x60] sm:$0xff] }
  0x3f   :  { %345 = vmatprep.mubr.bf16.mxu0 %v1889_v3  ;;  %v1333_v13 = vld [vmem:[%s2408_s8 + $0x78] sm:$0xff]  ;;  %v1332_v14 = vld [vmem:[%s2408_s8 + $0x70] sm:$0xff]  ;;  %v1729_v15 = vld [vmem:[#allocation2] sm:$0x1] }
  0x41   :  { %577 = vperm.xlu1 %1826, %v499_v43   ;;  %572 = vperm.xlu0 %1825, %v498_v44  }
  0x45   :  { %892 = vperm.xlu1 %1826, %v870_v45   ;;  %887 = vperm.xlu0 %1825, %v869_v46  }
  0x46   :  { %1797 = vmatmul.mubr.msk.bf16.gmra.mrb[28].mxu0 %vm218_vm0, %v1840_v47 }
  0x47   :  { %1045 = vmatprep.mubr.bf16.mxu0 %v1889_v3 }
  0x49   :  { %902 = vperm.xlu1 %1826, %v872_v48   ;;  %897 = vperm.xlu0 %1825, %v871_v49  }
  0x4d   :  { %912 = vperm.xlu1 %1826, %v874_v50   ;;  %907 = vperm.xlu0 %1825, %v873_v51  }
  0x51   :  { %922 = vperm.xlu1 %1826, %v876_v52   ;;  %917 = vperm.xlu0 %1825, %v875_v53  }
  0x55   :  { %932 = vperm.xlu1 %1826, %v878_v54   ;;  %927 = vperm.xlu0 %1825, %v877_v55  }
  0x59   :  { %942 = vperm.xlu1 %1826, %v880_v56   ;;  %937 = vperm.xlu0 %1825, %v879_v57  }
  0x5d   :  { %952 = vperm.xlu1 %1826, %v882_v58   ;;  %947 = vperm.xlu0 %1825, %v881_v59  }
  0x61   :  { %962 = vperm.xlu1 %1826, %v884_v60   ;;  %957 = vperm.xlu0 %1825, %v883_v61  }
  0x65   :  { %1341 = vperm.xlu1 %1826, %v1319_v62   ;;  %1336 = vperm.xlu0 %1825, %v1318_v63  }
  0x69   :  { %1351 = vperm.xlu1 %1826, %v1321_v0   ;;  %1346 = vperm.xlu0 %1825, %v1320_v1  }
  0x6d   :  { %1361 = vperm.xlu1 %1826, %v1323_v2   ;;  %1356 = vperm.xlu0 %1825, %v1322_v4  }
  0x71   :  { %1371 = vperm.xlu1 %1826, %v1325_v5   ;;  %1366 = vperm.xlu0 %1825, %v1324_v6  }
  0x75   :  { %1381 = vperm.xlu1 %1826, %v1327_v7   ;;  %1376 = vperm.xlu0 %1825, %v1326_v8  }
  0x79   :  { %1391 = vperm.xlu1 %1826, %v1329_v9   ;;  %1386 = vperm.xlu0 %1825, %v1328_v10  }
  0x7d   :  { %1401 = vperm.xlu1 %1826, %v1331_v11   ;;  %1396 = vperm.xlu0 %1825, %v1330_v12  }
  0x81   :  { %1411 = vperm.xlu1 %1826, %v1333_v13   ;;  %1406 = vperm.xlu0 %1825, %v1332_v14  }
  0x84   :  { %v81_v16 = vpop.permute.xlu0 %80  ;;  %v91_v25 = vpop.permute.xlu1 %90 }
  0x85   :  { %1732 = vperm.xlu0 %1825, %v1729_v15  }
  0x88   :  { %v86_v20 = vpop.permute.xlu0 %85  ;;  %v96_v39 = vpop.permute.xlu1 %95 }
  0x8c   :  { %v101_v52 = vpop.permute.xlu0 %100  ;;  %v106_v59 = vpop.permute.xlu1 %105 }
  0x90   :  { %v111_v9 = vpop.permute.xlu0 %110 }
  0xe1   :  { %v277_v17 = vpop.f32.mrb[0].mxu0 }
  0xe2   :  { %v278_v18 = vadd.f32 %v277_v17, %v81_v16  ;;  %v279_v19 = vpop.f32.mrb[1].mxu0 }
  0xe3   :  { %v280_v21 = vadd.f32 %v279_v19, %v81_v16  ;;  %v281_v22 = vpop.f32.mrb[2].mxu0  ;;  %v116_v16 = vpop.permute.xlu1 %115 }
  0xe4   :  { %v388_v23 = vmul.f32 0.01, %v278_v18  ;;  %v282_v24 = vadd.f32 %v281_v22, %v86_v20  ;;  %vm356_vm1 = vcmp.gt.f32.partialorder %v278_v18, 0.0  ;;  %v283_v26 = vpop.f32.mrb[3].mxu0 }
  0xe5   :  { %v389_v27 = vmul.f32 0.01, %v280_v21  ;;  %v284_v29 = vadd.f32 %v283_v26, %v86_v20  ;;  %vm357_vm3 = vcmp.gt.f32.partialorder %v280_v21, 0.0 }
  0xe6   :  { %vm358_vm2 = vcmp.gt.f32.partialorder %v282_v24, 0.0  ;;  %v390_v28 = vmul.f32 0.01, %v282_v24  ;;  %v420_v31 = vsel %vm356_vm1, %v278_v18, %v388_v23 }
  0xe7   :  { %vm359_vm4 = vcmp.gt.f32.partialorder %v284_v29, 0.0  ;;  %v391_v30 = vmul.f32 0.01, %v284_v29  ;;  %v421_v37 = vsel %vm357_vm3, %v280_v21, %v389_v27 }
  0xe8   :  { %v422_v32 = vsel %vm358_vm2, %v282_v24, %v390_v28 }
  0xe9   :  { %v287_v33 = vpop.f32.mrb[4].mxu0  ;;  %v2203_v34 = vpack.c.bf16 %v422_v32, %v420_v31  ;;  %v423_v38 = vsel %vm359_vm4, %v284_v29, %v391_v30  ;;  %v121_v29 = vpop.permute.xlu0 %120 }
  0xea   :  { %v288_v35 = vadd.f32 %v287_v33, %v91_v25  ;;  %v289_v36 = vpop.f32.mrb[5].mxu0  ;;  %v2205_v42 = vpack.c.bf16 %v423_v38, %v421_v37  ;;  %v126_v37 = vpop.permute.xlu1 %125 }
  0xeb   :  { %v290_v40 = vadd.f32 %v289_v36, %v91_v25  ;;  %v291_v41 = vpop.f32.mrb[6].mxu0 }
  0xec   :  { %v392_v43 = vmul.f32 0.01, %v288_v35  ;;  %v292_v44 = vadd.f32 %v291_v41, %v96_v39  ;;  %vm360_vm5 = vcmp.gt.f32.partialorder %v288_v35, 0.0  ;;  %v293_v45 = vpop.f32.mrb[7].mxu0  ;;  %628 = vmatprep.subr.bf16.mxu1 %v2205_v42 }
  0xed   :  { %v393_v46 = vmul.f32 0.01, %v290_v40  ;;  %v294_v48 = vadd.f32 %v293_v45, %v96_v39  ;;  %629 = vmatpush1.bf16.msra.mxu1 %v2203_v34  ;;  %vm361_vm7 = vcmp.gt.f32.partialorder %v290_v40, 0.0 }
  0xee   :  { %vm362_vm6 = vcmp.gt.f32.partialorder %v292_v44, 0.0  ;;  %v394_v47 = vmul.f32 0.01, %v292_v44  ;;  %v424_v50 = vsel %vm360_vm5, %v288_v35, %v392_v43 }
  0xef   :  { %vm363_vm8 = vcmp.gt.f32.partialorder %v294_v48, 0.0  ;;  %v395_v49 = vmul.f32 0.01, %v294_v48  ;;  %v425_v57 = vsel %vm361_vm7, %v290_v40, %v393_v46 }
  0xf0   :  { %v426_v51 = vsel %vm362_vm6, %v292_v44, %v394_v47 }
  0xf1   :  { %v297_v53 = vpop.f32.mrb[8].mxu0  ;;  %v2209_v54 = vpack.c.bf16 %v426_v51, %v424_v50  ;;  %v427_v58 = vsel %vm363_vm8, %v294_v48, %v395_v49  ;;  %v131_v51 = vpop.permute.xlu0 %130 }
  0xf2   :  { %v298_v55 = vadd.f32 %v297_v53, %v101_v52  ;;  %v299_v56 = vpop.f32.mrb[9].mxu0  ;;  %v2211_v62 = vpack.c.bf16 %v427_v58, %v425_v57 }
  0xf3   :  { %v300_v60 = vadd.f32 %v299_v56, %v101_v52  ;;  %v301_v61 = vpop.f32.mrb[10].mxu0 }
  0xf4   :  { %v396_v63 = vmul.f32 0.01, %v298_v55  ;;  %v302_v0 = vadd.f32 %v301_v61, %v106_v59  ;;  %vm364_vm9 = vcmp.gt.f32.partialorder %v298_v55, 0.0  ;;  %v303_v1 = vpop.f32.mrb[11].mxu0  ;;  %630 = vmatprep.subr.bf16.mxu1 %v2211_v62 }
  0xf5   :  { %v397_v2 = vmul.f32 0.01, %v300_v60  ;;  %v304_v5 = vadd.f32 %v303_v1, %v106_v59  ;;  %631 = vmatpush1.bf16.msra.mxu1 %v2209_v54  ;;  %vm365_vm11 = vcmp.gt.f32.partialorder %v300_v60, 0.0 }
  0xf6   :  { %vm366_vm10 = vcmp.gt.f32.partialorder %v302_v0, 0.0  ;;  %v398_v4 = vmul.f32 0.01, %v302_v0  ;;  %v428_v7 = vsel %vm364_vm9, %v298_v55, %v396_v63 }
  0xf7   :  { %vm367_vm12 = vcmp.gt.f32.partialorder %v304_v5, 0.0  ;;  %v399_v6 = vmul.f32 0.01, %v304_v5  ;;  %v429_v14 = vsel %vm365_vm11, %v300_v60, %v397_v2  ;;  %v136_v60 = vpop.permute.xlu1 %135 }
  0xf8   :  { %v430_v8 = vsel %vm366_vm10, %v302_v0, %v398_v4 }
  0xf9   :  { %v307_v10 = vpop.f32.mrb[12].mxu0  ;;  %v2215_v11 = vpack.c.bf16 %v430_v8, %v428_v7  ;;  %v431_v15 = vsel %vm367_vm12, %v304_v5, %v399_v6 }
  0xfa   :  { %v308_v12 = vadd.f32 %v307_v10, %v111_v9  ;;  %v309_v13 = vpop.f32.mrb[13].mxu0  ;;  %v2217_v19 = vpack.c.bf16 %v431_v15, %v429_v14  ;;  %v141_v10 = vpop.permute.xlu0 %140 }
  0xfb   :  { %v310_v17 = vadd.f32 %v309_v13, %v111_v9  ;;  %v311_v18 = vpop.f32.mrb[14].mxu0 }
  0xfc   :  { %v400_v20 = vmul.f32 0.01, %v308_v12  ;;  %v312_v21 = vadd.f32 %v311_v18, %v116_v16  ;;  %vm368_vm13 = vcmp.gt.f32.partialorder %v308_v12, 0.0  ;;  %v313_v22 = vpop.f32.mrb[15].mxu0  ;;  %632 = vmatprep.subr.bf16.mxu1 %v2217_v19 }
  0xfd   :  { %v401_v23 = vmul.f32 0.01, %v310_v17  ;;  %v314_v25 = vadd.f32 %v313_v22, %v116_v16  ;;  %633 = vmatpush1.bf16.msra.mxu1 %v2215_v11  ;;  %vm369_vm15 = vcmp.gt.f32.partialorder %v310_v17, 0.0 }
  0xfe   :  { %vm370_vm14 = vcmp.gt.f32.partialorder %v312_v21, 0.0  ;;  %v402_v24 = vmul.f32 0.01, %v312_v21  ;;  %v432_v27 = vsel %vm368_vm13, %v308_v12, %v400_v20  ;;  %v146_v20 = vpop.permute.xlu1 %145 }
  0xff   :  { %vm371_vm0 = vcmp.gt.f32.partialorder %v314_v25, 0.0  ;;  %v403_v26 = vmul.f32 0.01, %v314_v25  ;;  %v433_v35 = vsel %vm369_vm15, %v310_v17, %v401_v23 }
 0x100   :  { %v434_v28 = vsel %vm370_vm14, %v312_v21, %v402_v24 }
 0x101   :  { %v317_v30 = vpop.f32.mrb[16].mxu0  ;;  %v2221_v31 = vpack.c.bf16 %v434_v28, %v432_v27  ;;  %v435_v36 = vsel %vm371_vm0, %v314_v25, %v403_v26 }
 0x102   :  { %v318_v32 = vadd.f32 %v317_v30, %v121_v29  ;;  %v319_v33 = vpop.f32.mrb[17].mxu0  ;;  %v2223_v40 = vpack.c.bf16 %v435_v36, %v433_v35 }
 0x103   :  { %v320_v38 = vadd.f32 %v319_v33, %v121_v29  ;;  %v321_v39 = vpop.f32.mrb[18].mxu0  ;;  %v151_v33 = vpop.permute.xlu0 %150 }
 0x104   :  { %v404_v41 = vmul.f32 0.01, %v318_v32  ;;  %v322_v43 = vadd.f32 %v321_v39, %v126_v37  ;;  %v323_v44 = vpop.f32.mrb[19].mxu0  ;;  %vm372_vm1 = vcmp.gt.f32.partialorder %v318_v32, 0.0  ;;  %634 = vmatprep.subr.bf16.mxu1 %v2223_v40 }
 0x105   :  { %v405_v45 = vmul.f32 0.01, %v320_v38  ;;  %v324_v46 = vadd.f32 %v323_v44, %v126_v37  ;;  %vm373_vm2 = vcmp.gt.f32.partialorder %v320_v38, 0.0  ;;  %635 = vmatpush1.bf16.msra.mxu1 %v2221_v31  ;;  %v156_v44 = vpop.permute.xlu1 %155 }
 0x106   :  { %vm374_vm3 = vcmp.gt.f32.partialorder %v322_v43, 0.0  ;;  %v406_v47 = vmul.f32 0.01, %v322_v43  ;;  %v436_v49 = vsel %vm372_vm1, %v318_v32, %v404_v41 }
 0x107   :  { %vm375_vm4 = vcmp.gt.f32.partialorder %v324_v46, 0.0  ;;  %v407_v48 = vmul.f32 0.01, %v324_v46  ;;  %v437_v53 = vsel %vm373_vm2, %v320_v38, %v405_v45 }
 0x108   :  { %v438_v50 = vsel %vm374_vm3, %v322_v43, %v406_v47 }
 0x109   :  { %v327_v52 = vpop.f32.mrb[20].mxu0  ;;  %v439_v55 = vsel %vm375_vm4, %v324_v46, %v407_v48  ;;  %v2227_v56 = vpack.c.bf16 %v438_v50, %v436_v49 }
 0x10a   :  { %v328_v57 = vadd.f32 %v327_v52, %v131_v51  ;;  %v329_v58 = vpop.f32.mrb[21].mxu0  ;;  %v2229_v59 = vpack.c.bf16 %v439_v55, %v437_v53 }
 0x10b   :  { %v330_v61 = vadd.f32 %v329_v58, %v131_v51  ;;  %v331_v63 = vpop.f32.mrb[22].mxu0 }
 0x10c   :  { %v408_v0 = vmul.f32 0.01, %v328_v57  ;;  %v332_v1 = vadd.f32 %v331_v63, %v136_v60  ;;  %v333_v2 = vpop.f32.mrb[23].mxu0  ;;  %636 = vmatprep.subr.bf16.mxu1 %v2229_v59  ;;  %vm376_vm5 = vcmp.gt.f32.partialorder %v328_v57, 0.0 }
 0x10d   :  { %v409_v4 = vmul.f32 0.01, %v330_v61  ;;  %v334_v5 = vadd.f32 %v333_v2, %v136_v60  ;;  %637 = vmatpush1.bf16.msra.mxu1 %v2227_v56  ;;  %vm377_vm6 = vcmp.gt.f32.partialorder %v330_v61, 0.0  ;;  %v1843_v2 = vld [vmem:[%s2403_s3 + $0x10] sm:$0xff]  }
 0x10e   :  { %vm378_vm7 = vcmp.gt.f32.partialorder %v332_v1, 0.0  ;;  %v410_v6 = vmul.f32 0.01, %v332_v1  ;;  %v440_v8 = vsel %vm376_vm5, %v328_v57, %v408_v0  ;;  %v1841_v0 = vld [vmem:[%s2403_s3] sm:$0xff]  }
 0x10f   :  { %vm379_vm8 = vcmp.gt.f32.partialorder %v334_v5, 0.0  ;;  %v411_v7 = vmul.f32 0.01, %v334_v5  ;;  %v441_v13 = vsel %vm377_vm6, %v330_v61, %v409_v4  ;;  %v1844_v4 = vld [vmem:[%s2403_s3 + $0x18] sm:$0xff]  }
 0x110   :  { %v442_v9 = vsel %vm378_vm7, %v332_v1, %v410_v6  ;;  %v1842_v1 = vld [vmem:[%s2403_s3 + $0x8] sm:$0xff]  }
 0x111   :  { %v337_v12 = vpop.f32.mrb[24].mxu0  ;;  %v443_v14 = vsel %vm379_vm8, %v334_v5, %v411_v7  ;;  %v2233_v15 = vpack.c.bf16 %v442_v9, %v440_v8  ;;  %v1845_v5 = vld [vmem:[%s2403_s3 + $0x20] sm:$0xff]   ;;  %v1846_v6 = vld [vmem:[%s2403_s3 + $0x28] sm:$0xff]   ;;  %v1847_v7 = vld [vmem:[%s2403_s3 + $0x30] sm:$0xff]   ;;  %v503_v9 = vpop.permute.xlu0 %502 }
 0x112   :  { %v338_v16 = vadd.f32 %v337_v12, %v141_v10  ;;  %v339_v17 = vpop.f32.mrb[25].mxu0  ;;  %v2235_v18 = vpack.c.bf16 %v443_v14, %v441_v13  ;;  %v1848_v8 = vld [vmem:[%s2403_s3 + $0x38] sm:$0xff]   ;;  %v508_v14 = vpop.permute.xlu1 %507 }
 0x113   :  { %v340_v21 = vadd.f32 %v339_v17, %v141_v10  ;;  %v341_v22 = vpop.f32.mrb[26].mxu0 }
 0x114   :  { %v412_v23 = vmul.f32 0.01, %v338_v16  ;;  %v342_v24 = vadd.f32 %v341_v22, %v146_v20  ;;  %v343_v25 = vpop.f32.mrb[27].mxu0  ;;  %638 = vmatprep.subr.bf16.mxu1 %v2235_v18  ;;  %vm380_vm9 = vcmp.gt.f32.partialorder %v338_v16, 0.0 }
 0x115   :  { %v413_v26 = vmul.f32 0.01, %v340_v21  ;;  %v344_v27 = vadd.f32 %v343_v25, %v146_v20  ;;  %639 = vmatpush1.bf16.msra.mxu1 %v2233_v15  ;;  %vm381_vm10 = vcmp.gt.f32.partialorder %v340_v21, 0.0 }
 0x116   :  { %vm382_vm11 = vcmp.gt.f32.partialorder %v342_v24, 0.0  ;;  %v414_v28 = vmul.f32 0.01, %v342_v24  ;;  %v444_v30 = vsel %vm380_vm9, %v338_v16, %v412_v23 }
 0x117   :  { %vm383_vm12 = vcmp.gt.f32.partialorder %v344_v27, 0.0  ;;  %v415_v29 = vmul.f32 0.01, %v344_v27  ;;  %v445_v36 = vsel %vm381_vm10, %v340_v21, %v413_v26 }
 0x118   :  { %v446_v32 = vsel %vm382_vm11, %v342_v24, %v414_v28 }
 0x119   :  { %v347_v35 = vpop.f32.mrb[28].mxu0  ;;  %v447_v37 = vsel %vm383_vm12, %v344_v27, %v415_v29  ;;  %v2239_v38 = vpack.c.bf16 %v446_v32, %v444_v30  ;;  %v513_v29 = vpop.permute.xlu0 %512 }
 0x11a   :  { %v348_v39 = vadd.f32 %v347_v35, %v151_v33  ;;  %v349_v41 = vpop.f32.mrb[29].mxu0  ;;  %v2241_v43 = vpack.c.bf16 %v447_v37, %v445_v36 }
 0x11b   :  { %v350_v45 = vadd.f32 %v349_v41, %v151_v33  ;;  %v351_v46 = vpop.f32.mrb[30].mxu0  ;;  %v518_v41 = vpop.permute.xlu1 %517 }
 0x11c   :  { %v416_v47 = vmul.f32 0.01, %v348_v39  ;;  %v352_v48 = vadd.f32 %v351_v46, %v156_v44  ;;  %v353_v49 = vpop.f32.mrb[31].mxu0  ;;  %640 = vmatprep.subr.bf16.mxu1 %v2241_v43  ;;  %vm384_vm13 = vcmp.gt.f32.partialorder %v348_v39, 0.0 }
 0x11d   :  { %v417_v50 = vmul.f32 0.01, %v350_v45  ;;  %v354_v51 = vadd.f32 %v353_v49, %v156_v44  ;;  %641 = vmatpush1.bf16.msra.mxu1 %v2239_v38  ;;  %vm385_vm14 = vcmp.gt.f32.partialorder %v350_v45, 0.0 }
 0x11e   :  { %vm386_vm15 = vcmp.gt.f32.partialorder %v352_v48, 0.0  ;;  %v418_v52 = vmul.f32 0.01, %v352_v48  ;;  %v448_v55 = vsel %vm384_vm13, %v348_v39, %v416_v47 }
 0x11f   :  { %vm387_vm0 = vcmp.gt.f32.partialorder %v354_v51, 0.0  ;;  %v419_v53 = vmul.f32 0.01, %v354_v51  ;;  %v449_v58 = vsel %vm385_vm14, %v350_v45, %v417_v50 }
 0x120   :  { %v450_v57 = vsel %vm386_vm15, %v352_v48, %v418_v52 }
 0x121   :  { %v451_v60 = vsel %vm387_vm0, %v354_v51, %v419_v53  ;;  %v2245_v61 = vpack.c.bf16 %v450_v57, %v448_v55  ;;  %v523_v57 = vpop.permute.xlu0 %522 }
 0x122   :  { %v2247_v63 = vpack.c.bf16 %v451_v60, %v449_v58 }
 0x124   :  { %642 = vmatprep.subr.bf16.mxu1 %v2247_v63 }
 0x125   :  { %643 = vmatpush1.bf16.msra.mxu1 %v2245_v61 }
 0x128   :  { %661 = vmatmul.mubr.bf16.vlgmr.msra.gmra.mrb[0].mxu1 %v1841_v0 }
 0x129   :  { %670 = vmatprep.mubr.bf16.mxu1 %v1889_v3 }
 0x130   :  { %671 = vmatmul.mubr.bf16.gmra.mrb[4].mxu1 %v1842_v1 }
 0x131   :  { %680 = vmatprep.mubr.bf16.mxu1 %v1889_v3 }
 0x138   :  { %681 = vmatmul.mubr.bf16.gmra.mrb[8].mxu1 %v1843_v2 }
 0x139   :  { %690 = vmatprep.mubr.bf16.mxu1 %v1889_v3 }
 0x140   :  { %691 = vmatmul.mubr.bf16.gmra.mrb[12].mxu1 %v1844_v4 }
 0x141   :  { %700 = vmatprep.mubr.bf16.mxu1 %v1889_v3 }
 0x148   :  { %701 = vmatmul.mubr.bf16.gmra.mrb[16].mxu1 %v1845_v5 }
 0x149   :  { %710 = vmatprep.mubr.bf16.mxu1 %v1889_v3 }
 0x150   :  { %711 = vmatmul.mubr.bf16.gmra.mrb[20].mxu1 %v1846_v6  ;;  %v528_v6 = vpop.permute.xlu1 %527 }
 0x151   :  { %720 = vmatprep.mubr.bf16.mxu1 %v1889_v3 }
 0x158   :  { %721 = vmatmul.mubr.bf16.gmra.mrb[24].mxu1 %v1847_v7 }
 0x159   :  { %730 = vmatprep.mubr.bf16.mxu1 %v1889_v3 }
 0x160   :  { %731 = vmatmul.mubr.bf16.gmra.mrb[28].mxu1 %v1848_v8 }
 0x161   :  { %1494 = vmatprep.mubr.bf16.mxu1 %v1889_v3 }
 0x1fb   :  { %v662_v10 = vpop.f32.mrb[0].mxu1 }
 0x1fc   :  { %v663_v12 = vadd.f32 %v662_v10, %v503_v9  ;;  %v664_v13 = vpop.f32.mrb[1].mxu1 }
 0x1fd   :  { %v665_v16 = vadd.f32 %v664_v13, %v503_v9  ;;  %v666_v17 = vpop.f32.mrb[2].mxu1 }
 0x1fe   :  { %v773_v20 = vmul.f32 0.01, %v663_v12  ;;  %v667_v21 = vadd.f32 %v666_v17, %v508_v14  ;;  %v668_v22 = vpop.f32.mrb[3].mxu1  ;;  %vm741_vm1 = vcmp.gt.f32.partialorder %v663_v12, 0.0 }
 0x1ff   :  { %v774_v23 = vmul.f32 0.01, %v665_v16  ;;  %v669_v24 = vadd.f32 %v668_v22, %v508_v14  ;;  %vm742_vm2 = vcmp.gt.f32.partialorder %v665_v16, 0.0  ;;  %v533_v22 = vpop.permute.xlu0 %532 }
 0x200   :  { %vm743_vm3 = vcmp.gt.f32.partialorder %v667_v21, 0.0  ;;  %v775_v25 = vmul.f32 0.01, %v667_v21  ;;  %v805_v27 = vsel %vm741_vm1, %v663_v12, %v773_v20 }
 0x201   :  { %vm744_vm4 = vcmp.gt.f32.partialorder %v669_v24, 0.0  ;;  %v776_v26 = vmul.f32 0.01, %v669_v24  ;;  %v806_v33 = vsel %vm742_vm2, %v665_v16, %v774_v23 }
 0x202   :  { %v807_v28 = vsel %vm743_vm3, %v667_v21, %v775_v25 }
 0x203   :  { %v837_v30 = vpack.c.bf16 %v807_v28, %v805_v27  ;;  %v672_v32 = vpop.f32.mrb[4].mxu1  ;;  %v808_v35 = vsel %vm744_vm4, %v669_v24, %v776_v26 }
 0x204   :  { %v673_v36 = vadd.f32 %v672_v32, %v513_v29  ;;  %v674_v37 = vpop.f32.mrb[5].mxu1  ;;  %v838_v39 = vpack.c.bf16 %v808_v35, %v806_v33 }
 0x205   :  { %v675_v44 = vadd.f32 %v674_v37, %v513_v29  ;;  %v676_v45 = vpop.f32.mrb[6].mxu1 }
 0x206   :  { %v777_v46 = vmul.f32 0.01, %v673_v36  ;;  %v677_v47 = vadd.f32 %v676_v45, %v518_v41  ;;  %v678_v48 = vpop.f32.mrb[7].mxu1  ;;  %1013 = vmatprep.subr.bf16.mxu0 %v838_v39  ;;  %vm745_vm5 = vcmp.gt.f32.partialorder %v673_v36, 0.0 }
 0x207   :  { %v778_v49 = vmul.f32 0.01, %v675_v44  ;;  %v679_v50 = vadd.f32 %v678_v48, %v518_v41  ;;  %1014 = vmatpush1.bf16.msra.mxu0 %v837_v30  ;;  %vm746_vm6 = vcmp.gt.f32.partialorder %v675_v44, 0.0  ;;  %v538_v30 = vpop.permute.xlu1 %537  ;;  %v543_v48 = vpop.permute.xlu0 %542 }
 0x208   :  { %vm747_vm7 = vcmp.gt.f32.partialorder %v677_v47, 0.0  ;;  %v779_v51 = vmul.f32 0.01, %v677_v47  ;;  %v809_v53 = vsel %vm745_vm5, %v673_v36, %v777_v46 }
 0x209   :  { %vm748_vm8 = vcmp.gt.f32.partialorder %v679_v50, 0.0  ;;  %v780_v52 = vmul.f32 0.01, %v679_v50  ;;  %v810_v0 = vsel %vm746_vm6, %v675_v44, %v778_v49 }
 0x20a   :  { %v811_v55 = vsel %vm747_vm7, %v677_v47, %v779_v51 }
 0x20b   :  { %v839_v58 = vpack.c.bf16 %v811_v55, %v809_v53  ;;  %v682_v60 = vpop.f32.mrb[8].mxu1  ;;  %v812_v1 = vsel %vm748_vm8, %v679_v50, %v780_v52 }
 0x20c   :  { %v683_v2 = vadd.f32 %v682_v60, %v523_v57  ;;  %v684_v4 = vpop.f32.mrb[9].mxu1  ;;  %v840_v5 = vpack.c.bf16 %v812_v1, %v810_v0 }
 0x20d   :  { %v685_v7 = vadd.f32 %v684_v4, %v523_v57  ;;  %v686_v8 = vpop.f32.mrb[10].mxu1 }
 0x20e   :  { %v781_v9 = vmul.f32 0.01, %v683_v2  ;;  %v687_v10 = vadd.f32 %v686_v8, %v528_v6  ;;  %v688_v12 = vpop.f32.mrb[11].mxu1  ;;  %1015 = vmatprep.subr.bf16.mxu0 %v840_v5  ;;  %vm749_vm9 = vcmp.gt.f32.partialorder %v683_v2, 0.0 }
 0x20f   :  { %v782_v13 = vmul.f32 0.01, %v685_v7  ;;  %v689_v14 = vadd.f32 %v688_v12, %v528_v6  ;;  %1016 = vmatpush1.bf16.msra.mxu0 %v839_v58  ;;  %vm750_vm10 = vcmp.gt.f32.partialorder %v685_v7, 0.0  ;;  %v548_v58 = vpop.permute.xlu1 %547  ;;  %v553_v12 = vpop.permute.xlu0 %552 }
 0x210   :  { %vm751_vm11 = vcmp.gt.f32.partialorder %v687_v10, 0.0  ;;  %v783_v16 = vmul.f32 0.01, %v687_v10  ;;  %v813_v20 = vsel %vm749_vm9, %v683_v2, %v781_v9 }
 0x211   :  { %vm752_vm12 = vcmp.gt.f32.partialorder %v689_v14, 0.0  ;;  %v784_v17 = vmul.f32 0.01, %v689_v14  ;;  %v814_v25 = vsel %vm750_vm10, %v685_v7, %v782_v13 }
 0x212   :  { %v815_v21 = vsel %vm751_vm11, %v687_v10, %v783_v16 }
 0x213   :  { %v841_v23 = vpack.c.bf16 %v815_v21, %v813_v20  ;;  %v692_v24 = vpop.f32.mrb[12].mxu1  ;;  %v816_v26 = vsel %vm752_vm12, %v689_v14, %v784_v17 }
 0x214   :  { %v693_v27 = vadd.f32 %v692_v24, %v533_v22  ;;  %v694_v28 = vpop.f32.mrb[13].mxu1  ;;  %v842_v29 = vpack.c.bf16 %v816_v26, %v814_v25 }
 0x215   :  { %v695_v32 = vadd.f32 %v694_v28, %v533_v22  ;;  %v696_v33 = vpop.f32.mrb[14].mxu1 }
 0x216   :  { %v785_v35 = vmul.f32 0.01, %v693_v27  ;;  %v697_v36 = vadd.f32 %v696_v33, %v538_v30  ;;  %v698_v37 = vpop.f32.mrb[15].mxu1  ;;  %1017 = vmatprep.subr.bf16.mxu0 %v842_v29  ;;  %vm753_vm13 = vcmp.gt.f32.partialorder %v693_v27, 0.0 }
 0x217   :  { %v786_v39 = vmul.f32 0.01, %v695_v32  ;;  %v699_v41 = vadd.f32 %v698_v37, %v538_v30  ;;  %1018 = vmatpush1.bf16.msra.mxu0 %v841_v23  ;;  %vm754_vm14 = vcmp.gt.f32.partialorder %v695_v32, 0.0  ;;  %v558_v23 = vpop.permute.xlu1 %557  ;;  %v563_v37 = vpop.permute.xlu0 %562 }
 0x218   :  { %vm755_vm15 = vcmp.gt.f32.partialorder %v697_v36, 0.0  ;;  %v787_v44 = vmul.f32 0.01, %v697_v36  ;;  %v817_v46 = vsel %vm753_vm13, %v693_v27, %v785_v35 }
 0x219   :  { %vm756_vm0 = vcmp.gt.f32.partialorder %v699_v41, 0.0  ;;  %v788_v45 = vmul.f32 0.01, %v699_v41  ;;  %v818_v51 = vsel %vm754_vm14, %v695_v32, %v786_v39 }
 0x21a   :  { %v819_v47 = vsel %vm755_vm15, %v697_v36, %v787_v44 }
 0x21b   :  { %v843_v49 = vpack.c.bf16 %v819_v47, %v817_v46  ;;  %v702_v50 = vpop.f32.mrb[16].mxu1  ;;  %v820_v52 = vsel %vm756_vm0, %v699_v41, %v788_v45 }
 0x21c   :  { %v703_v53 = vadd.f32 %v702_v50, %v543_v48  ;;  %v704_v55 = vpop.f32.mrb[17].mxu1  ;;  %v844_v57 = vpack.c.bf16 %v820_v52, %v818_v51 }
 0x21d   :  { %v705_v60 = vadd.f32 %v704_v55, %v543_v48  ;;  %v706_v0 = vpop.f32.mrb[18].mxu1 }
 0x21e   :  { %v789_v1 = vmul.f32 0.01, %v703_v53  ;;  %v707_v2 = vadd.f32 %v706_v0, %v548_v58  ;;  %v708_v4 = vpop.f32.mrb[19].mxu1  ;;  %1019 = vmatprep.subr.bf16.mxu0 %v844_v57  ;;  %vm757_vm1 = vcmp.gt.f32.partialorder %v703_v53, 0.0 }
 0x21f   :  { %v790_v5 = vmul.f32 0.01, %v705_v60  ;;  %v709_v6 = vadd.f32 %v708_v4, %v548_v58  ;;  %1020 = vmatpush1.bf16.msra.mxu0 %v843_v49  ;;  %vm758_vm2 = vcmp.gt.f32.partialorder %v705_v60, 0.0  ;;  %v568_v49 = vpop.permute.xlu1 %567  ;;  %v573_v4 = vpop.permute.xlu0 %572 }
 0x220   :  { %vm759_vm3 = vcmp.gt.f32.partialorder %v707_v2, 0.0  ;;  %v791_v7 = vmul.f32 0.01, %v707_v2  ;;  %v821_v9 = vsel %vm757_vm1, %v703_v53, %v789_v1 }
 0x221   :  { %vm760_vm4 = vcmp.gt.f32.partialorder %v709_v6, 0.0  ;;  %v792_v8 = vmul.f32 0.01, %v709_v6  ;;  %v822_v16 = vsel %vm758_vm2, %v705_v60, %v790_v5 }
 0x222   :  { %v823_v10 = vsel %vm759_vm3, %v707_v2, %v791_v7 }
 0x223   :  { %v845_v13 = vpack.c.bf16 %v823_v10, %v821_v9  ;;  %v712_v14 = vpop.f32.mrb[20].mxu1  ;;  %v824_v17 = vsel %vm760_vm4, %v709_v6, %v792_v8 }
 0x224   :  { %v713_v20 = vadd.f32 %v712_v14, %v553_v12  ;;  %v714_v21 = vpop.f32.mrb[21].mxu1  ;;  %v846_v22 = vpack.c.bf16 %v824_v17, %v822_v16 }
 0x225   :  { %v715_v24 = vadd.f32 %v714_v21, %v553_v12  ;;  %v716_v25 = vpop.f32.mrb[22].mxu1 }
 0x226   :  { %v793_v26 = vmul.f32 0.01, %v713_v20  ;;  %v717_v27 = vadd.f32 %v716_v25, %v558_v23  ;;  %v718_v28 = vpop.f32.mrb[23].mxu1  ;;  %1021 = vmatprep.subr.bf16.mxu0 %v846_v22  ;;  %vm761_vm5 = vcmp.gt.f32.partialorder %v713_v20, 0.0 }
 0x227   :  { %v794_v29 = vmul.f32 0.01, %v715_v24  ;;  %v719_v30 = vadd.f32 %v718_v28, %v558_v23  ;;  %1022 = vmatpush1.bf16.msra.mxu0 %v845_v13  ;;  %vm762_vm6 = vcmp.gt.f32.partialorder %v715_v24, 0.0  ;;  %v578_v13 = vpop.permute.xlu1 %577 }
 0x228   :  { %vm763_vm7 = vcmp.gt.f32.partialorder %v717_v27, 0.0  ;;  %v795_v32 = vmul.f32 0.01, %v717_v27  ;;  %v825_v35 = vsel %vm761_vm5, %v713_v20, %v793_v26 }
 0x229   :  { %vm764_vm8 = vcmp.gt.f32.partialorder %v719_v30, 0.0  ;;  %v796_v33 = vmul.f32 0.01, %v719_v30  ;;  %v826_v44 = vsel %vm762_vm6, %v715_v24, %v794_v29 }
 0x22a   :  { %v827_v36 = vsel %vm763_vm7, %v717_v27, %v795_v32 }
 0x22b   :  { %v847_v39 = vpack.c.bf16 %v827_v36, %v825_v35  ;;  %v722_v41 = vpop.f32.mrb[24].mxu1  ;;  %v828_v45 = vsel %vm764_vm8, %v719_v30, %v796_v33  ;;  %v1849_v33 = vld [vmem:[%s2405_s5] sm:$0xff]   ;;  %v1850_v35 = vld [vmem:[%s2405_s5 + $0x8] sm:$0xff]   ;;  %v1851_v36 = vld [vmem:[%s2405_s5 + $0x10] sm:$0xff]  }
 0x22c   :  { %v723_v46 = vadd.f32 %v722_v41, %v563_v37  ;;  %v724_v47 = vpop.f32.mrb[25].mxu1  ;;  %v848_v48 = vpack.c.bf16 %v828_v45, %v826_v44  ;;  %v1854_v41 = vld [vmem:[%s2405_s5 + $0x28] sm:$0xff]   ;;  %v1855_v44 = vld [vmem:[%s2405_s5 + $0x30] sm:$0xff]   ;;  %v1856_v45 = vld [vmem:[%s2405_s5 + $0x38] sm:$0xff]  }
 0x22d   :  { %v725_v50 = vadd.f32 %v724_v47, %v563_v37  ;;  %v726_v51 = vpop.f32.mrb[26].mxu1  ;;  %v1852_v37 = vld [vmem:[%s2405_s5 + $0x18] sm:$0xff]  }
 0x22e   :  { %v797_v52 = vmul.f32 0.01, %v723_v46  ;;  %v727_v53 = vadd.f32 %v726_v51, %v568_v49  ;;  %v728_v55 = vpop.f32.mrb[27].mxu1  ;;  %1023 = vmatprep.subr.bf16.mxu0 %v848_v48  ;;  %vm765_vm9 = vcmp.gt.f32.partialorder %v723_v46, 0.0  ;;  %v893_v51 = vpop.permute.xlu1 %892 }
 0x22f   :  { %v798_v57 = vmul.f32 0.01, %v725_v50  ;;  %v729_v58 = vadd.f32 %v728_v55, %v568_v49  ;;  %1024 = vmatpush1.bf16.msra.mxu0 %v847_v39  ;;  %vm766_vm10 = vcmp.gt.f32.partialorder %v725_v50, 0.0  ;;  %v1853_v39 = vld [vmem:[%s2405_s5 + $0x20] sm:$0xff]   ;;  %v1126_v49 = vunpack.c.l.bf16 %v2203_v34 }
 0x230   :  { %vm767_vm11 = vcmp.gt.f32.partialorder %v727_v53, 0.0  ;;  %v799_v60 = vmul.f32 0.01, %v727_v53  ;;  %v829_v1 = vsel %vm765_vm9, %v723_v46, %v797_v52  ;;  %v888_v46 = vpop.permute.xlu0 %887 }
 0x231   :  { %vm768_vm12 = vcmp.gt.f32.partialorder %v729_v58, 0.0  ;;  %v800_v0 = vmul.f32 0.01, %v729_v58  ;;  %v830_v7 = vsel %vm766_vm10, %v725_v50, %v798_v57 }
 0x232   :  { %v831_v2 = vsel %vm767_vm11, %v727_v53, %v799_v60  ;;  %v1127_v53 = vunpack.c.l.bf16 %v2205_v42  ;;  %v1128_v60 = vunpack.c.h.bf16 %v2203_v34 }
 0x233   :  { %v849_v5 = vpack.c.bf16 %v831_v2, %v829_v1  ;;  %v732_v6 = vpop.f32.mrb[28].mxu1  ;;  %v832_v8 = vsel %vm768_vm12, %v729_v58, %v800_v0 }
 0x234   :  { %v733_v9 = vadd.f32 %v732_v6, %v573_v4  ;;  %v734_v10 = vpop.f32.mrb[29].mxu1  ;;  %v850_v12 = vpack.c.bf16 %v832_v8, %v830_v7 }
 0x235   :  { %v735_v14 = vadd.f32 %v734_v10, %v573_v4  ;;  %v736_v16 = vpop.f32.mrb[30].mxu1  ;;  %v1129_v4 = vunpack.c.h.bf16 %v2205_v42  ;;  %v898_v10 = vpop.permute.xlu0 %897  ;;  %v1131_v42 = vunpack.c.l.bf16 %v2211_v62 }
 0x236   :  { %v801_v17 = vmul.f32 0.01, %v733_v9  ;;  %v737_v20 = vadd.f32 %v736_v16, %v578_v13  ;;  %v738_v21 = vpop.f32.mrb[31].mxu1  ;;  %1025 = vmatprep.subr.bf16.mxu0 %v850_v12  ;;  %vm769_vm13 = vcmp.gt.f32.partialorder %v733_v9, 0.0 }
 0x237   :  { %v802_v22 = vmul.f32 0.01, %v735_v14  ;;  %v739_v23 = vadd.f32 %v738_v21, %v578_v13  ;;  %1026 = vmatpush1.bf16.msra.mxu0 %v849_v5  ;;  %vm770_vm14 = vcmp.gt.f32.partialorder %v735_v14, 0.0  ;;  %v903_v21 = vpop.permute.xlu1 %902 }
 0x238   :  { %vm771_vm15 = vcmp.gt.f32.partialorder %v737_v20, 0.0  ;;  %v803_v24 = vmul.f32 0.01, %v737_v20  ;;  %v833_v26 = vsel %vm769_vm13, %v733_v9, %v801_v17 }
 0x239   :  { %vm772_vm0 = vcmp.gt.f32.partialorder %v739_v23, 0.0  ;;  %v804_v25 = vmul.f32 0.01, %v739_v23  ;;  %v834_v29 = vsel %vm770_vm14, %v735_v14, %v802_v22  ;;  %v1130_v14 = vunpack.c.l.bf16 %v2209_v54 }
 0x23a   :  { %v835_v27 = vsel %vm771_vm15, %v737_v20, %v803_v24 }
 0x23b   :  { %v851_v28 = vpack.c.bf16 %v835_v27, %v833_v26  ;;  %v836_v30 = vsel %vm772_vm0, %v739_v23, %v804_v25 }
 0x23c   :  { %v852_v32 = vpack.c.bf16 %v836_v30, %v834_v29  ;;  %v1132_v29 = vunpack.c.h.bf16 %v2209_v54 }
 0x23e   :  { %1027 = vmatprep.subr.bf16.mxu0 %v852_v32 }
 0x23f   :  { %1028 = vmatpush1.bf16.msra.mxu0 %v851_v28 }
 0x242   :  { %1046 = vmatmul.mubr.bf16.vlgmr.msra.gmra.mrb[32].mxu0 %v1849_v33 }
 0x243   :  { %1055 = vmatprep.mubr.bf16.mxu0 %v1889_v3 }
 0x24a   :  { %1056 = vmatmul.mubr.bf16.gmra.mrb[36].mxu0 %v1850_v35 }
 0x24b   :  { %1065 = vmatprep.mubr.bf16.mxu0 %v1889_v3 }
 0x252   :  { %1066 = vmatmul.mubr.bf16.gmra.mrb[40].mxu0 %v1851_v36  ;;  %v1133_v36 = vunpack.c.h.bf16 %v2211_v62 }
 0x253   :  { %1075 = vmatprep.mubr.bf16.mxu0 %v1889_v3 }
 0x25a   :  { %1076 = vmatmul.mubr.bf16.gmra.mrb[44].mxu0 %v1852_v37 }
 0x25b   :  { %1085 = vmatprep.mubr.bf16.mxu0 %v1889_v3 }
 0x262   :  { %1086 = vmatmul.mubr.bf16.gmra.mrb[48].mxu0 %v1853_v39 }
 0x263   :  { %1095 = vmatprep.mubr.bf16.mxu0 %v1889_v3 }
 0x26a   :  { %1096 = vmatmul.mubr.bf16.gmra.mrb[52].mxu0 %v1854_v41 }
 0x26b   :  { %1105 = vmatprep.mubr.bf16.mxu0 %v1889_v3 }
 0x272   :  { %1106 = vmatmul.mubr.bf16.gmra.mrb[56].mxu0 %v1855_v44 }
 0x273   :  { %1115 = vmatprep.mubr.bf16.mxu0 %v1889_v3 }
 0x27a   :  { %1116 = vmatmul.mubr.bf16.gmra.mrb[60].mxu0 %v1856_v45 }
 0x27b   :  { %1720 = vmatprep.mubr.bf16.mxu0 %v1889_v3 }
 0x315   :  { %v1047_v47 = vpop.f32.mrb[32].mxu0 }
 0x316   :  { %v1048_v48 = vadd.f32 %v1047_v47, %v888_v46  ;;  %v1049_v50 = vpop.f32.mrb[33].mxu0 }
 0x317   :  { %v1050_v52 = vadd.f32 %v1049_v50, %v888_v46  ;;  %v1051_v55 = vpop.f32.mrb[34].mxu0  ;;  %v908_v46 = vpop.permute.xlu0 %907 }
 0x318   :  { %v1158_v57 = vadd.f32 %v1126_v49, %v1048_v48  ;;  %v1052_v58 = vadd.f32 %v1051_v55, %v893_v51  ;;  %v1053_v0 = vpop.f32.mrb[35].mxu0  ;;  %v1134_v48 = vunpack.c.l.bf16 %v2215_v11 }
 0x319   :  { %v1159_v1 = vadd.f32 %v1127_v53, %v1050_v52  ;;  %v1054_v2 = vadd.f32 %v1053_v0, %v893_v51  ;;  %v1135_v52 = vunpack.c.l.bf16 %v2217_v19  ;;  %v913_v53 = vpop.permute.xlu1 %912 }
 0x31a   :  { %v1222_v5 = vmul.f32 0.01, %v1158_v57  ;;  %v1160_v6 = vadd.f32 %v1128_v60, %v1052_v58  ;;  %vm1190_vm1 = vcmp.gt.f32.partialorder %v1158_v57, 0.0 }
 0x31b   :  { %v1223_v7 = vmul.f32 0.01, %v1159_v1  ;;  %v1161_v8 = vadd.f32 %v1129_v4, %v1054_v2  ;;  %vm1191_vm2 = vcmp.gt.f32.partialorder %v1159_v1, 0.0  ;;  %v1136_v4 = vunpack.c.h.bf16 %v2215_v11 }
 0x31c   :  { %vm1192_vm3 = vcmp.gt.f32.partialorder %v1160_v6, 0.0  ;;  %v1224_v9 = vmul.f32 0.01, %v1160_v6  ;;  %v1254_v34 = vsel %vm1190_vm1, %v1158_v57, %v1222_v5 }
 0x31d   :  { %vm1193_vm4 = vcmp.gt.f32.partialorder %v1161_v8, 0.0  ;;  %v1225_v12 = vmul.f32 0.01, %v1161_v8  ;;  %v1057_v13 = vpop.f32.mrb[36].mxu0  ;;  %v1255_v24 = vsel %vm1191_vm2, %v1159_v1, %v1223_v7 }
 0x31e   :  { %v1256_v16 = vsel %vm1192_vm3, %v1160_v6, %v1224_v9  ;;  %v1058_v17 = vadd.f32 %v1057_v13, %v898_v10  ;;  %v1059_v20 = vpop.f32.mrb[37].mxu0  ;;  %v1137_v9 = vunpack.c.h.bf16 %v2217_v19 }
 0x31f   :  { %v1060_v22 = vadd.f32 %v1059_v20, %v898_v10  ;;  %v1061_v23 = vpop.f32.mrb[38].mxu0  ;;  %v1257_v25 = vsel %vm1193_vm4, %v1161_v8, %v1225_v12  ;;  %v1286_v26 = vpack.c.bf16 %v1256_v16, %v1254_v34  ;;  %v918_v16 = vpop.permute.xlu0 %917  ;;  %v1138_v20 = vunpack.c.l.bf16 %v2221_v31 }
 0x320   :  { %v1162_v27 = vadd.f32 %v1130_v14, %v1058_v17  ;;  %v1062_v28 = vadd.f32 %v1061_v23, %v903_v21  ;;  %v1063_v30 = vpop.f32.mrb[39].mxu0  ;;  %v1287_v32 = vpack.c.bf16 %v1257_v25, %v1255_v24  ;;  %v1139_v23 = vunpack.c.l.bf16 %v2223_v40  ;;  %v923_v24 = vpop.permute.xlu1 %922 }
 0x321   :  { %v1163_v33 = vadd.f32 %v1131_v42, %v1060_v22  ;;  %v1064_v35 = vadd.f32 %v1063_v30, %v903_v21 }
 0x322   :  { %v1226_v37 = vmul.f32 0.01, %v1162_v27  ;;  %v1164_v39 = vadd.f32 %v1132_v29, %v1062_v28  ;;  %1462 = vmatprep.subr.bf16.mxu1 %v1287_v32  ;;  %vm1194_vm5 = vcmp.gt.f32.partialorder %v1162_v27, 0.0 }
 0x323   :  { %v1227_v41 = vmul.f32 0.01, %v1163_v33  ;;  %v1165_v44 = vadd.f32 %v1133_v36, %v1064_v35  ;;  %1463 = vmatpush1.bf16.msra.mxu1 %v1286_v26  ;;  %vm1195_vm6 = vcmp.gt.f32.partialorder %v1163_v33, 0.0 }
 0x324   :  { %vm1196_vm7 = vcmp.gt.f32.partialorder %v1164_v39, 0.0  ;;  %v1228_v45 = vmul.f32 0.01, %v1164_v39  ;;  %v1258_v49 = vsel %vm1194_vm5, %v1162_v27, %v1226_v37 }
 0x325   :  { %vm1197_vm8 = vcmp.gt.f32.partialorder %v1165_v44, 0.0  ;;  %v1229_v47 = vmul.f32 0.01, %v1165_v44  ;;  %v1067_v54 = vpop.f32.mrb[40].mxu0  ;;  %v1259_v58 = vsel %vm1195_vm6, %v1163_v33, %v1227_v41  ;;  %v1140_v33 = vunpack.c.h.bf16 %v2221_v31 }
 0x326   :  { %v1260_v50 = vsel %vm1196_vm7, %v1164_v39, %v1228_v45  ;;  %v1068_v51 = vadd.f32 %v1067_v54, %v908_v46  ;;  %v1069_v62 = vpop.f32.mrb[41].mxu0  ;;  %v1141_v41 = vunpack.c.h.bf16 %v2223_v40 }
 0x327   :  { %v1070_v55 = vadd.f32 %v1069_v62, %v908_v46  ;;  %v1071_v57 = vpop.f32.mrb[42].mxu0  ;;  %v1261_v60 = vsel %vm1197_vm8, %v1165_v44, %v1229_v47  ;;  %v1288_v0 = vpack.c.bf16 %v1260_v50, %v1258_v49  ;;  %v1142_v50 = vunpack.c.l.bf16 %v2227_v56 }
 0x328   :  { %v1166_v1 = vadd.f32 %v1134_v48, %v1068_v51  ;;  %v1072_v2 = vadd.f32 %v1071_v57, %v913_v53  ;;  %v1073_v5 = vpop.f32.mrb[43].mxu0  ;;  %v1289_v6 = vpack.c.bf16 %v1261_v60, %v1259_v58  ;;  %v928_v48 = vpop.permute.xlu0 %927 }
 0x329   :  { %v1167_v7 = vadd.f32 %v1135_v52, %v1070_v55  ;;  %v1074_v8 = vadd.f32 %v1073_v5, %v913_v53  ;;  %v1143_v53 = vunpack.c.l.bf16 %v2229_v59  ;;  %v933_v55 = vpop.permute.xlu1 %932  ;;  %v1144_v5 = vunpack.c.h.bf16 %v2227_v56 }
 0x32a   :  { %v1230_v10 = vmul.f32 0.01, %v1166_v1  ;;  %v1168_v12 = vadd.f32 %v1136_v4, %v1072_v2  ;;  %1464 = vmatprep.subr.bf16.mxu1 %v1289_v6  ;;  %vm1198_vm9 = vcmp.gt.f32.partialorder %v1166_v1, 0.0 }
 0x32b   :  { %v1231_v13 = vmul.f32 0.01, %v1167_v7  ;;  %v1169_v14 = vadd.f32 %v1137_v9, %v1074_v8  ;;  %1465 = vmatpush1.bf16.msra.mxu1 %v1288_v0  ;;  %vm1199_vm10 = vcmp.gt.f32.partialorder %v1167_v7, 0.0 }
 0x32c   :  { %vm1200_vm11 = vcmp.gt.f32.partialorder %v1168_v12, 0.0  ;;  %v1232_v34 = vmul.f32 0.01, %v1168_v12  ;;  %v1262_v42 = vsel %vm1198_vm9, %v1166_v1, %v1230_v10  ;;  %v1145_v10 = vunpack.c.h.bf16 %v2229_v59 }
 0x32d   :  { %vm1201_vm12 = vcmp.gt.f32.partialorder %v1169_v14, 0.0  ;;  %v1233_v17 = vmul.f32 0.01, %v1169_v14  ;;  %v1077_v11 = vpop.f32.mrb[44].mxu0  ;;  %v1263_v27 = vsel %vm1199_vm10, %v1167_v7, %v1231_v13 }
 0x32e   :  { %v1264_v21 = vsel %vm1200_vm11, %v1168_v12, %v1232_v34  ;;  %v1078_v22 = vadd.f32 %v1077_v11, %v918_v16  ;;  %v1079_v19 = vpop.f32.mrb[45].mxu0 }
 0x32f   :  { %v1080_v25 = vadd.f32 %v1079_v19, %v918_v16  ;;  %v1081_v26 = vpop.f32.mrb[46].mxu0  ;;  %v1265_v28 = vsel %vm1201_vm12, %v1169_v14, %v1233_v17  ;;  %v1290_v29 = vpack.c.bf16 %v1264_v21, %v1262_v42  ;;  %v938_v17 = vpop.permute.xlu0 %937  ;;  %v1147_v19 = vunpack.c.l.bf16 %v2235_v18 }
 0x330   :  { %v1170_v30 = vadd.f32 %v1138_v20, %v1078_v22  ;;  %v1082_v32 = vadd.f32 %v1081_v26, %v923_v24  ;;  %v1083_v35 = vpop.f32.mrb[47].mxu0  ;;  %v1291_v36 = vpack.c.bf16 %v1265_v28, %v1263_v27  ;;  %v1146_v20 = vunpack.c.l.bf16 %v2233_v15 }
 0x331   :  { %v1171_v37 = vadd.f32 %v1139_v23, %v1080_v25  ;;  %v1084_v39 = vadd.f32 %v1083_v35, %v923_v24  ;;  %v943_v23 = vpop.permute.xlu1 %942 }
 0x332   :  { %v1234_v44 = vmul.f32 0.01, %v1170_v30  ;;  %v1172_v45 = vadd.f32 %v1140_v33, %v1082_v32  ;;  %1466 = vmatprep.subr.bf16.mxu1 %v1291_v36  ;;  %vm1202_vm13 = vcmp.gt.f32.partialorder %v1170_v30, 0.0  ;;  %v1148_v32 = vunpack.c.h.bf16 %v2233_v15 }
 0x333   :  { %v1235_v46 = vmul.f32 0.01, %v1171_v37  ;;  %v1173_v47 = vadd.f32 %v1141_v41, %v1084_v39  ;;  %1467 = vmatpush1.bf16.msra.mxu1 %v1290_v29  ;;  %vm1203_vm14 = vcmp.gt.f32.partialorder %v1171_v37, 0.0  ;;  %v1149_v39 = vunpack.c.h.bf16 %v2235_v18 }
 0x334   :  { %vm1204_vm15 = vcmp.gt.f32.partialorder %v1172_v45, 0.0  ;;  %v1236_v54 = vmul.f32 0.01, %v1172_v45  ;;  %v1266_v51 = vsel %vm1202_vm13, %v1170_v30, %v1234_v44 }
 0x335   :  { %vm1205_vm0 = vcmp.gt.f32.partialorder %v1173_v47, 0.0  ;;  %v1237_v49 = vmul.f32 0.01, %v1173_v47  ;;  %v1087_v31 = vpop.f32.mrb[48].mxu0  ;;  %v1267_v60 = vsel %vm1203_vm14, %v1171_v37, %v1235_v46 }
 0x336   :  { %v1268_v62 = vsel %vm1204_vm15, %v1172_v45, %v1236_v54  ;;  %v1088_v52 = vadd.f32 %v1087_v31, %v928_v48  ;;  %v1089_v40 = vpop.f32.mrb[49].mxu0  ;;  %v948_v54 = vpop.permute.xlu0 %947 }
 0x337   :  { %v1090_v57 = vadd.f32 %v1089_v40, %v928_v48  ;;  %v1091_v58 = vpop.f32.mrb[50].mxu0  ;;  %v1269_v0 = vsel %vm1205_vm0, %v1173_v47, %v1237_v49  ;;  %v1292_v1 = vpack.c.bf16 %v1268_v62, %v1266_v51  ;;  %v1150_v49 = vunpack.c.l.bf16 %v2239_v38 }
 0x338   :  { %v1174_v2 = vadd.f32 %v1142_v50, %v1088_v52  ;;  %v1092_v4 = vadd.f32 %v1091_v58, %v933_v55  ;;  %v1093_v6 = vpop.f32.mrb[51].mxu0  ;;  %v1293_v7 = vpack.c.bf16 %v1269_v0, %v1267_v60  ;;  %v1151_v62 = vunpack.c.l.bf16 %v2241_v43  ;;  %v953_v52 = vpop.permute.xlu1 %952 }
 0x339   :  { %v1175_v8 = vadd.f32 %v1143_v53, %v1090_v57  ;;  %v1094_v9 = vadd.f32 %v1093_v6, %v933_v55 }
 0x33a   :  { %v1238_v12 = vmul.f32 0.01, %v1174_v2  ;;  %v1176_v13 = vadd.f32 %v1144_v5, %v1092_v4  ;;  %1468 = vmatprep.subr.bf16.mxu1 %v1293_v7  ;;  %vm1206_vm1 = vcmp.gt.f32.partialorder %v1174_v2, 0.0  ;;  %v1153_v7 = vunpack.c.h.bf16 %v2241_v43 }
 0x33b   :  { %v1239_v14 = vmul.f32 0.01, %v1175_v8  ;;  %v1177_v34 = vadd.f32 %v1145_v10, %v1094_v9  ;;  %1469 = vmatpush1.bf16.msra.mxu1 %v1292_v1  ;;  %vm1207_vm2 = vcmp.gt.f32.partialorder %v1175_v8, 0.0  ;;  %v1152_v1 = vunpack.c.h.bf16 %v2239_v38 }
 0x33c   :  { %vm1208_vm3 = vcmp.gt.f32.partialorder %v1176_v13, 0.0  ;;  %v1240_v16 = vmul.f32 0.01, %v1176_v13  ;;  %v1270_v42 = vsel %vm1206_vm1, %v1174_v2, %v1238_v12 }
 0x33d   :  { %vm1209_vm4 = vcmp.gt.f32.partialorder %v1177_v34, 0.0  ;;  %v1241_v11 = vmul.f32 0.01, %v1177_v34  ;;  %v1097_v56 = vpop.f32.mrb[52].mxu0  ;;  %v1271_v26 = vsel %vm1207_vm2, %v1175_v8, %v1239_v14  ;;  %v958_v14 = vpop.permute.xlu0 %957 }
 0x33e   :  { %v1272_v21 = vsel %vm1208_vm3, %v1176_v13, %v1240_v16  ;;  %v1098_v22 = vadd.f32 %v1097_v56, %v938_v17  ;;  %v1099_v59 = vpop.f32.mrb[53].mxu0  ;;  %v1154_v16 = vunpack.c.l.bf16 %v2245_v61 }
 0x33f   :  { %v1100_v24 = vadd.f32 %v1099_v59, %v938_v17  ;;  %v1101_v25 = vpop.f32.mrb[54].mxu0  ;;  %v1273_v27 = vsel %vm1209_vm4, %v1177_v34, %v1241_v11  ;;  %v1294_v28 = vpack.c.bf16 %v1272_v21, %v1270_v42  ;;  %v963_v42 = vpop.permute.xlu1 %962 }
 0x340   :  { %v1178_v29 = vadd.f32 %v1146_v20, %v1098_v22  ;;  %v1102_v30 = vadd.f32 %v1101_v25, %v943_v23  ;;  %v1103_v33 = vpop.f32.mrb[55].mxu0  ;;  %v1295_v35 = vpack.c.bf16 %v1273_v27, %v1271_v26  ;;  %v1155_v20 = vunpack.c.l.bf16 %v2247_v63 }
 0x341   :  { %v1179_v36 = vadd.f32 %v1147_v19, %v1100_v24  ;;  %v1104_v37 = vadd.f32 %v1103_v33, %v943_v23  ;;  %v1156_v26 = vunpack.c.h.bf16 %v2245_v61 }
 0x342   :  { %v1242_v41 = vmul.f32 0.01, %v1178_v29  ;;  %v1180_v44 = vadd.f32 %v1148_v32, %v1102_v30  ;;  %1470 = vmatprep.subr.bf16.mxu1 %v1295_v35  ;;  %vm1210_vm5 = vcmp.gt.f32.partialorder %v1178_v29, 0.0  ;;  %v1157_v32 = vunpack.c.h.bf16 %v2247_v63  ;;  %v1857_v63 = vld [vmem:[%s2407_s7] sm:$0xff]  }
 0x343   :  { %v1243_v45 = vmul.f32 0.01, %v1179_v36  ;;  %v1181_v46 = vadd.f32 %v1149_v39, %v1104_v37  ;;  %1471 = vmatpush1.bf16.msra.mxu1 %v1294_v28  ;;  %vm1211_vm6 = vcmp.gt.f32.partialorder %v1179_v36, 0.0 }
 0x344   :  { %vm1212_vm7 = vcmp.gt.f32.partialorder %v1180_v44, 0.0  ;;  %v1244_v47 = vmul.f32 0.01, %v1180_v44  ;;  %v1274_v31 = vsel %vm1210_vm5, %v1178_v29, %v1242_v41 }
 0x345   :  { %vm1213_vm8 = vcmp.gt.f32.partialorder %v1181_v46, 0.0  ;;  %v1245_v48 = vmul.f32 0.01, %v1181_v46  ;;  %v1107_v15 = vpop.f32.mrb[56].mxu0  ;;  %v1275_v55 = vsel %vm1211_vm6, %v1179_v36, %v1243_v45 }
 0x346   :  { %v1276_v50 = vsel %vm1212_vm7, %v1180_v44, %v1244_v47  ;;  %v1108_v51 = vadd.f32 %v1107_v15, %v948_v54  ;;  %v1109_v18 = vpop.f32.mrb[57].mxu0  ;;  %v1859_v15 = vld [vmem:[%s2407_s7 + $0x10] sm:$0xff]  }
 0x347   :  { %v1110_v40 = vadd.f32 %v1109_v18, %v948_v54  ;;  %v1111_v53 = vpop.f32.mrb[58].mxu0  ;;  %v1277_v57 = vsel %vm1213_vm8, %v1181_v46, %v1245_v48  ;;  %v1296_v58 = vpack.c.bf16 %v1276_v50, %v1274_v31  ;;  %v1858_v48 = vld [vmem:[%s2407_s7 + $0x8] sm:$0xff]   ;;  %v1861_v31 = vld [vmem:[%s2407_s7 + $0x20] sm:$0xff]   ;;  %v1864_v18 = vld [vmem:[%s2407_s7 + $0x38] sm:$0xff]  }
 0x348   :  { %v1182_v60 = vadd.f32 %v1150_v49, %v1108_v51  ;;  %v1112_v0 = vadd.f32 %v1111_v53, %v953_v52  ;;  %v1113_v2 = vpop.f32.mrb[59].mxu0  ;;  %v1297_v4 = vpack.c.bf16 %v1277_v57, %v1275_v55  ;;  %v1860_v49 = vld [vmem:[%s2407_s7 + $0x18] sm:$0xff]   ;;  %v1862_v50 = vld [vmem:[%s2407_s7 + $0x28] sm:$0xff]   ;;  %v1863_v51 = vld [vmem:[%s2407_s7 + $0x30] sm:$0xff]   ;;  %v1342_v55 = vpop.permute.xlu1 %1341 }
 0x349   :  { %v1183_v5 = vadd.f32 %v1151_v62, %v1110_v40  ;;  %v1114_v6 = vadd.f32 %v1113_v2, %v953_v52  ;;  %v1337_v62 = vpop.permute.xlu0 %1336 }
 0x34a   :  { %v1246_v8 = vmul.f32 0.01, %v1182_v60  ;;  %v1184_v9 = vadd.f32 %v1152_v1, %v1112_v0  ;;  %1472 = vmatprep.subr.bf16.mxu1 %v1297_v4  ;;  %vm1214_vm9 = vcmp.gt.f32.partialorder %v1182_v60, 0.0 }
 0x34b   :  { %v1247_v10 = vmul.f32 0.01, %v1183_v5  ;;  %v1185_v12 = vadd.f32 %v1153_v7, %v1114_v6  ;;  %1473 = vmatpush1.bf16.msra.mxu1 %v1296_v58  ;;  %vm1215_vm10 = vcmp.gt.f32.partialorder %v1183_v5, 0.0 }
 0x34c   :  { %vm1216_vm11 = vcmp.gt.f32.partialorder %v1184_v9, 0.0  ;;  %v1248_v13 = vmul.f32 0.01, %v1184_v9  ;;  %v1278_v17 = vsel %vm1214_vm9, %v1182_v60, %v1246_v8 }
 0x34d   :  { %vm1217_vm12 = vcmp.gt.f32.partialorder %v1185_v12, 0.0  ;;  %v1249_v34 = vmul.f32 0.01, %v1185_v12  ;;  %v1117_v38 = vpop.f32.mrb[60].mxu0  ;;  %v1279_v59 = vsel %vm1215_vm10, %v1183_v5, %v1247_v10  ;;  %v1347_v8 = vpop.permute.xlu0 %1346 }
 0x34e   :  { %v1280_v11 = vsel %vm1216_vm11, %v1184_v9, %v1248_v13  ;;  %v1118_v56 = vadd.f32 %v1117_v38, %v958_v14  ;;  %v1119_v43 = vpop.f32.mrb[61].mxu0 }
 0x34f   :  { %v1120_v21 = vadd.f32 %v1119_v43, %v958_v14  ;;  %v1121_v22 = vpop.f32.mrb[62].mxu0  ;;  %v1281_v19 = vsel %vm1217_vm12, %v1185_v12, %v1249_v34  ;;  %v1298_v23 = vpack.c.bf16 %v1280_v11, %v1278_v17 }
 0x350   :  { %v1186_v24 = vadd.f32 %v1154_v16, %v1118_v56  ;;  %v1122_v25 = vadd.f32 %v1121_v22, %v963_v42  ;;  %v1123_v27 = vpop.f32.mrb[63].mxu0  ;;  %v1299_v28 = vpack.c.bf16 %v1281_v19, %v1279_v59  ;;  %v1352_v16 = vpop.permute.xlu1 %1351 }
 0x351   :  { %v1187_v29 = vadd.f32 %v1155_v20, %v1120_v21  ;;  %v1124_v30 = vadd.f32 %v1123_v27, %v963_v42 }
 0x352   :  { %v1250_v33 = vmul.f32 0.01, %v1186_v24  ;;  %v1188_v35 = vadd.f32 %v1156_v26, %v1122_v25  ;;  %1474 = vmatprep.subr.bf16.mxu1 %v1299_v28  ;;  %vm1218_vm13 = vcmp.gt.f32.partialorder %v1186_v24, 0.0 }
 0x353   :  { %v1251_v36 = vmul.f32 0.01, %v1187_v29  ;;  %v1189_v37 = vadd.f32 %v1157_v32, %v1124_v30  ;;  %1475 = vmatpush1.bf16.msra.mxu1 %v1298_v23  ;;  %vm1219_vm14 = vcmp.gt.f32.partialorder %v1187_v29, 0.0 }
 0x354   :  { %vm1220_vm15 = vcmp.gt.f32.partialorder %v1188_v35, 0.0  ;;  %v1252_v39 = vmul.f32 0.01, %v1188_v35  ;;  %v1282_v44 = vsel %vm1218_vm13, %v1186_v24, %v1250_v33  ;;  %v1357_v24 = vpop.permute.xlu0 %1356  ;;  %v1362_v33 = vpop.permute.xlu1 %1361 }
 0x355   :  { %vm1221_vm0 = vcmp.gt.f32.partialorder %v1189_v37, 0.0  ;;  %v1253_v41 = vmul.f32 0.01, %v1189_v37  ;;  %v1283_v45 = vsel %vm1219_vm14, %v1187_v29, %v1251_v36 }
 0x356   :  { %v1284_v61 = vsel %vm1220_vm15, %v1188_v35, %v1252_v39 }
 0x357   :  { %v1285_v46 = vsel %vm1221_vm0, %v1189_v37, %v1253_v41  ;;  %v1300_v47 = vpack.c.bf16 %v1284_v61, %v1282_v44 }
 0x358   :  { %v1301_v54 = vpack.c.bf16 %v1285_v46, %v1283_v45 }
 0x35a   :  { %1476 = vmatprep.subr.bf16.mxu1 %v1301_v54 }
 0x35b   :  { %1477 = vmatpush1.bf16.msra.mxu1 %v1300_v47 }
 0x35e   :  { %1495 = vmatmul.mubr.bf16.vlgmr.msra.gmra.mrb[32].mxu1 %v1857_v63  ;;  %v1367_v63 = vpop.permute.xlu0 %1366 }
 0x35f   :  { %1504 = vmatprep.mubr.bf16.mxu1 %v1889_v3 }
 0x366   :  { %1505 = vmatmul.mubr.bf16.gmra.mrb[36].mxu1 %v1858_v48 }
 0x367   :  { %1514 = vmatprep.mubr.bf16.mxu1 %v1889_v3 }
 0x36e   :  { %1515 = vmatmul.mubr.bf16.gmra.mrb[40].mxu1 %v1859_v15 }
 0x36f   :  { %1524 = vmatprep.mubr.bf16.mxu1 %v1889_v3 }
 0x376   :  { %1525 = vmatmul.mubr.bf16.gmra.mrb[44].mxu1 %v1860_v49 }
 0x377   :  { %1534 = vmatprep.mubr.bf16.mxu1 %v1889_v3 }
 0x37e   :  { %1535 = vmatmul.mubr.bf16.gmra.mrb[48].mxu1 %v1861_v31 }
 0x37f   :  { %1544 = vmatprep.mubr.bf16.mxu1 %v1889_v3 }
 0x386   :  { %1545 = vmatmul.mubr.bf16.gmra.mrb[52].mxu1 %v1862_v50 }
 0x387   :  { %1554 = vmatprep.mubr.bf16.mxu1 %v1889_v3 }
 0x38e   :  { %1555 = vmatmul.mubr.bf16.gmra.mrb[56].mxu1 %v1863_v51 }
 0x38f   :  { %1564 = vmatprep.mubr.bf16.mxu1 %v1889_v3 }
 0x396   :  { %1565 = vmatmul.mubr.bf16.gmra.mrb[60].mxu1 %v1864_v18 }
 0x431   :  { %v1496_v52 = vpop.f32.mrb[32].mxu1 }
 0x432   :  { %v1497_v40 = vadd.f32 %v1496_v52, %v1337_v62  ;;  %v1498_v53 = vpop.f32.mrb[33].mxu1 }
 0x433   :  { %v1499_v57 = vadd.f32 %v1498_v53, %v1337_v62  ;;  %v1500_v58 = vpop.f32.mrb[34].mxu1  ;;  %v1372_v62 = vpop.permute.xlu1 %1371 }
 0x434   :  { %v1607_v60 = vmul.f32 0.01, %v1497_v40  ;;  %v1501_v0 = vadd.f32 %v1500_v58, %v1342_v55  ;;  %v1502_v1 = vpop.f32.mrb[35].mxu1  ;;  %vm1575_vm1 = vcmp.gt.f32.partialorder %v1497_v40, 0.0 }
 0x435   :  { %v1608_v2 = vmul.f32 0.01, %v1499_v57  ;;  %v1503_v4 = vadd.f32 %v1502_v1, %v1342_v55  ;;  %vm1576_vm2 = vcmp.gt.f32.partialorder %v1499_v57, 0.0 }
 0x436   :  { %vm1577_vm3 = vcmp.gt.f32.partialorder %v1501_v0, 0.0  ;;  %v1609_v3 = vmul.f32 0.01, %v1501_v0  ;;  %v1639_v6 = vsel %vm1575_vm1, %v1497_v40, %v1607_v60 }
 0x437   :  { %vm1578_vm4 = vcmp.gt.f32.partialorder %v1503_v4, 0.0  ;;  %v1610_v5 = vmul.f32 0.01, %v1503_v4  ;;  %v1640_v12 = vsel %vm1576_vm2, %v1499_v57, %v1608_v2 }
 0x438   :  { %v1641_v7 = vsel %vm1577_vm3, %v1501_v0, %v1609_v3  ;;  %v1377_v3 = vpop.permute.xlu0 %1376 }
 0x439   :  { %v1671_v9 = vpack.c.bf16 %v1641_v7, %v1639_v6  ;;  %v1506_v10 = vpop.f32.mrb[36].mxu1  ;;  %v1642_v13 = vsel %vm1578_vm4, %v1503_v4, %v1610_v5 }
 0x43a   :  { %v1507_v14 = vadd.f32 %v1506_v10, %v1347_v8  ;;  %v1508_v34 = vpop.f32.mrb[37].mxu1  ;;  %v1672_v38 = vpack.c.bf16 %v1642_v13, %v1640_v12  ;;  %v1382_v13 = vpop.permute.xlu1 %1381 }
 0x43b   :  { %v1509_v17 = vadd.f32 %v1508_v34, %v1347_v8  ;;  %v1510_v11 = vpop.f32.mrb[38].mxu1 }
 0x43c   :  { %v1611_v56 = vmul.f32 0.01, %v1507_v14  ;;  %v1511_v43 = vadd.f32 %v1510_v11, %v1352_v16  ;;  %v1512_v20 = vpop.f32.mrb[39].mxu1  ;;  %1688 = vmatprep.subr.bf16.mxu0 %v1672_v38  ;;  %vm1579_vm5 = vcmp.gt.f32.partialorder %v1507_v14, 0.0 }
 0x43d   :  { %v1612_v42 = vmul.f32 0.01, %v1509_v17  ;;  %v1513_v21 = vadd.f32 %v1512_v20, %v1352_v16  ;;  %1689 = vmatpush1.bf16.msra.mxu0 %v1671_v9  ;;  %vm1580_vm6 = vcmp.gt.f32.partialorder %v1509_v17, 0.0 }
 0x43e   :  { %vm1581_vm7 = vcmp.gt.f32.partialorder %v1511_v43, 0.0  ;;  %v1613_v22 = vmul.f32 0.01, %v1511_v43  ;;  %v1643_v19 = vsel %vm1579_vm5, %v1507_v14, %v1611_v56 }
 0x43f   :  { %vm1582_vm8 = vcmp.gt.f32.partialorder %v1513_v21, 0.0  ;;  %v1614_v59 = vmul.f32 0.01, %v1513_v21  ;;  %v1644_v27 = vsel %vm1580_vm6, %v1509_v17, %v1612_v42 }
 0x440   :  { %v1645_v23 = vsel %vm1581_vm7, %v1511_v43, %v1613_v22  ;;  %v1387_v22 = vpop.permute.xlu0 %1386 }
 0x441   :  { %v1673_v25 = vpack.c.bf16 %v1645_v23, %v1643_v19  ;;  %v1516_v26 = vpop.f32.mrb[40].mxu1  ;;  %v1646_v28 = vsel %vm1582_vm8, %v1513_v21, %v1614_v59 }
 0x442   :  { %v1517_v29 = vadd.f32 %v1516_v26, %v1357_v24  ;;  %v1518_v30 = vpop.f32.mrb[41].mxu1  ;;  %v1674_v32 = vpack.c.bf16 %v1646_v28, %v1644_v27  ;;  %v1392_v28 = vpop.permute.xlu1 %1391 }
 0x443   :  { %v1519_v35 = vadd.f32 %v1518_v30, %v1357_v24  ;;  %v1520_v36 = vpop.f32.mrb[42].mxu1 }
 0x444   :  { %v1615_v37 = vmul.f32 0.01, %v1517_v29  ;;  %v1521_v39 = vadd.f32 %v1520_v36, %v1362_v33  ;;  %v1522_v41 = vpop.f32.mrb[43].mxu1  ;;  %1690 = vmatprep.subr.bf16.mxu0 %v1674_v32  ;;  %vm1583_vm9 = vcmp.gt.f32.partialorder %v1517_v29, 0.0 }
 0x445   :  { %v1616_v44 = vmul.f32 0.01, %v1519_v35  ;;  %v1523_v61 = vadd.f32 %v1522_v41, %v1362_v33  ;;  %1691 = vmatpush1.bf16.msra.mxu0 %v1673_v25  ;;  %vm1584_vm10 = vcmp.gt.f32.partialorder %v1519_v35, 0.0 }
 0x446   :  { %vm1585_vm11 = vcmp.gt.f32.partialorder %v1521_v39, 0.0  ;;  %v1617_v45 = vmul.f32 0.01, %v1521_v39  ;;  %v1647_v47 = vsel %vm1583_vm9, %v1517_v29, %v1615_v37 }
 0x447   :  { %vm1586_vm12 = vcmp.gt.f32.partialorder %v1523_v61, 0.0  ;;  %v1618_v46 = vmul.f32 0.01, %v1523_v61  ;;  %v1648_v49 = vsel %vm1584_vm10, %v1519_v35, %v1616_v44 }
 0x448   :  { %v1649_v54 = vsel %vm1585_vm11, %v1521_v39, %v1617_v45  ;;  %v1397_v45 = vpop.permute.xlu0 %1396 }
 0x449   :  { %v1675_v48 = vpack.c.bf16 %v1649_v54, %v1647_v47  ;;  %v1526_v15 = vpop.f32.mrb[44].mxu1  ;;  %v1650_v31 = vsel %vm1586_vm12, %v1523_v61, %v1618_v46 }
 0x44a   :  { %v1527_v50 = vadd.f32 %v1526_v15, %v1367_v63  ;;  %v1528_v51 = vpop.f32.mrb[45].mxu1  ;;  %v1676_v18 = vpack.c.bf16 %v1650_v31, %v1648_v49  ;;  %v1402_v31 = vpop.permute.xlu1 %1401 }
 0x44b   :  { %v1529_v52 = vadd.f32 %v1528_v51, %v1367_v63  ;;  %v1530_v40 = vpop.f32.mrb[46].mxu1 }
 0x44c   :  { %v1619_v53 = vmul.f32 0.01, %v1527_v50  ;;  %v1531_v55 = vadd.f32 %v1530_v40, %v1372_v62  ;;  %v1532_v57 = vpop.f32.mrb[47].mxu1  ;;  %1692 = vmatprep.subr.bf16.mxu0 %v1676_v18  ;;  %vm1587_vm13 = vcmp.gt.f32.partialorder %v1527_v50, 0.0 }
 0x44d   :  { %v1620_v58 = vmul.f32 0.01, %v1529_v52  ;;  %v1533_v60 = vadd.f32 %v1532_v57, %v1372_v62  ;;  %1693 = vmatpush1.bf16.msra.mxu0 %v1675_v48  ;;  %vm1588_vm14 = vcmp.gt.f32.partialorder %v1529_v52, 0.0 }
 0x44e   :  { %vm1589_vm15 = vcmp.gt.f32.partialorder %v1531_v55, 0.0  ;;  %v1621_v0 = vmul.f32 0.01, %v1531_v55  ;;  %v1651_v2 = vsel %vm1587_vm13, %v1527_v50, %v1619_v53 }
 0x44f   :  { %vm1590_vm0 = vcmp.gt.f32.partialorder %v1533_v60, 0.0  ;;  %v1622_v1 = vmul.f32 0.01, %v1533_v60  ;;  %v1652_v7 = vsel %vm1588_vm14, %v1529_v52, %v1620_v58 }
 0x450   :  { %v1653_v4 = vsel %vm1589_vm15, %v1531_v55, %v1621_v0  ;;  %v1407_v0 = vpop.permute.xlu0 %1406 }
 0x451   :  { %v1677_v5 = vpack.c.bf16 %v1653_v4, %v1651_v2  ;;  %v1536_v6 = vpop.f32.mrb[48].mxu1  ;;  %v1654_v8 = vsel %vm1590_vm0, %v1533_v60, %v1622_v1 }
 0x452   :  { %v1537_v9 = vadd.f32 %v1536_v6, %v1377_v3  ;;  %v1538_v10 = vpop.f32.mrb[49].mxu1  ;;  %v1678_v12 = vpack.c.bf16 %v1654_v8, %v1652_v7  ;;  %v1412_v8 = vpop.permute.xlu1 %1411 }
 0x453   :  { %v1539_v14 = vadd.f32 %v1538_v10, %v1377_v3  ;;  %v1540_v34 = vpop.f32.mrb[50].mxu1 }
 0x454   :  { %v1623_v38 = vmul.f32 0.01, %v1537_v9  ;;  %v1541_v16 = vadd.f32 %v1540_v34, %v1382_v13  ;;  %v1542_v17 = vpop.f32.mrb[51].mxu1  ;;  %1694 = vmatprep.subr.bf16.mxu0 %v1678_v12  ;;  %vm1591_vm1 = vcmp.gt.f32.partialorder %v1537_v9, 0.0 }
 0x455   :  { %v1624_v11 = vmul.f32 0.01, %v1539_v14  ;;  %v1543_v56 = vadd.f32 %v1542_v17, %v1382_v13  ;;  %1695 = vmatpush1.bf16.msra.mxu0 %v1677_v5  ;;  %vm1592_vm2 = vcmp.gt.f32.partialorder %v1539_v14, 0.0 }
 0x456   :  { %vm1593_vm3 = vcmp.gt.f32.partialorder %v1541_v16, 0.0  ;;  %v1625_v43 = vmul.f32 0.01, %v1541_v16  ;;  %v1655_v42 = vsel %vm1591_vm1, %v1537_v9, %v1623_v38 }
 0x457   :  { %vm1594_vm4 = vcmp.gt.f32.partialorder %v1543_v56, 0.0  ;;  %v1626_v20 = vmul.f32 0.01, %v1543_v56  ;;  %v1656_v23 = vsel %vm1592_vm2, %v1539_v14, %v1624_v11 }
 0x458   :  { %v1657_v21 = vsel %vm1593_vm3, %v1541_v16, %v1625_v43 }
 0x459   :  { %v1679_v59 = vpack.c.bf16 %v1657_v21, %v1655_v42  ;;  %v1546_v19 = vpop.f32.mrb[52].mxu1  ;;  %v1658_v24 = vsel %vm1594_vm4, %v1543_v56, %v1626_v20 }
 0x45a   :  { %v1547_v25 = vadd.f32 %v1546_v19, %v1387_v22  ;;  %v1548_v26 = vpop.f32.mrb[53].mxu1  ;;  %v1680_v27 = vpack.c.bf16 %v1658_v24, %v1656_v23  ;;  %v1890_v23 = vmov 1966171168  }
 0x45b   :  { %v1549_v29 = vadd.f32 %v1548_v26, %v1387_v22  ;;  %v1550_v30 = vpop.f32.mrb[54].mxu1  ;;  %v1687_v22 = vld [vmem:[%s2409_s9] sm:$0xf]  ;;  %v1745_v24 = vunpack.c.l.s4 %v1890_v23  ;;  %v1733_v26 = vpop.permute.xlu0 %1732  ;;  %s1865_s9 = scalar_lea.vmem %s1771_s1, 32 }
 0x45c   :  { %v1627_v32 = vmul.f32 0.01, %v1547_v25  ;;  %v1551_v33 = vadd.f32 %v1550_v30, %v1392_v28  ;;  %v1552_v35 = vpop.f32.mrb[55].mxu1  ;;  %1696 = vmatprep.subr.bf16.mxu0 %v1680_v27  ;;  %vm1595_vm5 = vcmp.gt.f32.partialorder %v1547_v25, 0.0  ;;  %p1866_p0 = scmp.ne.s32.totalorder %s1771_s1, %s1865_s9  ;;  %p1871_p2 = scmp.lt.s32.totalorder %s1865_s9, %s1865_s9 }
 0x45d   :  { %v1628_v36 = vmul.f32 0.01, %v1549_v29  ;;  %v1553_v37 = vadd.f32 %v1552_v35, %v1392_v28  ;;  %1697 = vmatpush1.bf16.msra.mxu0 %v1679_v59  ;;  %vm1596_vm6 = vcmp.gt.f32.partialorder %v1549_v29, 0.0  ;;  %v1735_v59 = vlaneseq }
 0x45e   :  { %vm1597_vm7 = vcmp.gt.f32.partialorder %v1551_v33, 0.0  ;;  %v1629_v39 = vmul.f32 0.01, %v1551_v33  ;;  %v1659_v44 = vsel %vm1595_vm5, %v1547_v25, %v1627_v32  ;;  %v1746_v27 = vunpack.c.0.s8 %v1745_v24  ;;  %p1872_p3 = por %p1871_p2, %p1870_p1 }
 0x45f   :  { %vm1598_vm8 = vcmp.gt.f32.partialorder %v1553_v37, 0.0  ;;  %v1630_v41 = vmul.f32 0.01, %v1553_v37  ;;  %v1660_v54 = vsel %vm1596_vm6, %v1549_v29, %v1628_v36  ;;  %v1736_v19 = vshrl.u32 %v1735_v59, 7 }
 0x460   :  { %v1661_v61 = vsel %vm1597_vm7, %v1551_v33, %v1629_v39  ;;  %vm1761_vm1 = vcmp.lt.s32.totalorder %v1735_v59, 256  ;;  %p1873_p4 = pnand %p1872_p3, %p1866_p0 }
 0x461   :  { %v1681_v46 = vpack.c.bf16 %v1661_v61, %v1659_v44  ;;  %v1556_v47 = vpop.f32.mrb[56].mxu1  ;;  %v1662_v63 = vsel %vm1598_vm8, %v1553_v37, %v1630_v41  ;;  %v1737_v25 = vsub.s32 0, %v1736_v19  ;;  %v1749_v35 = vsub.s32 %v1746_v27, %v1736_v19 }
 0x462   :  { %v1557_v48 = vadd.f32 %v1556_v47, %v1397_v45  ;;  %v1558_v15 = vpop.f32.mrb[57].mxu1  ;;  %v1682_v49 = vpack.c.bf16 %v1662_v63, %v1660_v54 }
 0x463   :  { %v1559_v50 = vadd.f32 %v1558_v15, %v1397_v45  ;;  %v1560_v51 = vpop.f32.mrb[58].mxu1  ;;  %v1738_v28 = vrot.slane %v1733_v26, %v1737_v25 }
 0x464   :  { %v1631_v18 = vmul.f32 0.01, %v1557_v48  ;;  %v1561_v62 = vadd.f32 %v1560_v51, %v1402_v31  ;;  %v1562_v52 = vpop.f32.mrb[59].mxu1  ;;  %1698 = vmatprep.subr.bf16.mxu0 %v1682_v49  ;;  %vm1599_vm9 = vcmp.gt.f32.partialorder %v1557_v48, 0.0 }
 0x465   :  { %v1632_v40 = vmul.f32 0.01, %v1559_v50  ;;  %v1563_v53 = vadd.f32 %v1562_v52, %v1402_v31  ;;  %1699 = vmatpush1.bf16.msra.mxu0 %v1681_v46  ;;  %vm1600_vm10 = vcmp.gt.f32.partialorder %v1559_v50, 0.0 }
 0x466   :  { %vm1601_vm11 = vcmp.gt.f32.partialorder %v1561_v62, 0.0  ;;  %v1633_v55 = vmul.f32 0.01, %v1561_v62  ;;  %v1663_v58 = vsel %vm1599_vm9, %v1557_v48, %v1631_v18 }
 0x467   :  { %vm1602_vm12 = vcmp.gt.f32.partialorder %v1563_v53, 0.0  ;;  %v1634_v57 = vmul.f32 0.01, %v1563_v53  ;;  %v1664_v4 = vsel %vm1600_vm10, %v1559_v50, %v1632_v40 }
 0x468   :  { %v1665_v60 = vsel %vm1601_vm11, %v1561_v62, %v1633_v55 }
 0x469   :  { %v1683_v1 = vpack.c.bf16 %v1665_v60, %v1663_v58  ;;  %v1566_v2 = vpop.f32.mrb[60].mxu1  ;;  %v1666_v3 = vsel %vm1602_vm12, %v1563_v53, %v1634_v57 }
 0x46a   :  { %v1567_v5 = vadd.f32 %v1566_v2, %v1407_v0  ;;  %v1568_v6 = vpop.f32.mrb[61].mxu1  ;;  %v1684_v7 = vpack.c.bf16 %v1666_v3, %v1664_v4 }
 0x46b   :  { %v1569_v9 = vadd.f32 %v1568_v6, %v1407_v0  ;;  %v1570_v10 = vpop.f32.mrb[62].mxu1 }
 0x46c   :  { %v1635_v12 = vmul.f32 0.01, %v1567_v5  ;;  %v1571_v13 = vadd.f32 %v1570_v10, %v1412_v8  ;;  %v1572_v14 = vpop.f32.mrb[63].mxu1  ;;  %1700 = vmatprep.subr.bf16.mxu0 %v1684_v7  ;;  %vm1603_vm13 = vcmp.gt.f32.partialorder %v1567_v5, 0.0 }
 0x46d   :  { %v1636_v34 = vmul.f32 0.01, %v1569_v9  ;;  %v1573_v38 = vadd.f32 %v1572_v14, %v1412_v8  ;;  %1701 = vmatpush1.bf16.msra.mxu0 %v1683_v1  ;;  %vm1604_vm14 = vcmp.gt.f32.partialorder %v1569_v9, 0.0 }
 0x46e   :  { %vm1605_vm15 = vcmp.gt.f32.partialorder %v1571_v13, 0.0  ;;  %v1637_v16 = vmul.f32 0.01, %v1571_v13  ;;  %v1667_v11 = vsel %vm1603_vm13, %v1567_v5, %v1635_v12 }
 0x46f   :  { %vm1606_vm0 = vcmp.gt.f32.partialorder %v1573_v38, 0.0  ;;  %v1638_v17 = vmul.f32 0.01, %v1573_v38  ;;  %v1668_v20 = vsel %vm1604_vm14, %v1569_v9, %v1636_v34 }
 0x470   :  { %v1669_v56 = vsel %vm1605_vm15, %v1571_v13, %v1637_v16 }
 0x471   :  { %v1685_v43 = vpack.c.bf16 %v1669_v56, %v1667_v11  ;;  %v1670_v42 = vsel %vm1606_vm0, %v1573_v38, %v1638_v17 }
 0x472   :  { %v1686_v21 = vpack.c.bf16 %v1670_v42, %v1668_v20 }
 0x474   :  { %1702 = vmatprep.subr.bf16.mxu0 %v1686_v21 }
 0x475   :  { %1703 = vmatpush1.bf16.msra.mxu0 %v1685_v43 }
 0x478   :  { %1721 = vmatmul.mubr.bf16.vlgmr.msra.gmra.mrb[64].mxu0 %v1687_v22 }
 0x54b   :  { %v1722_v29 = vpop.f32.mrb[64].mxu0 }
 0x54c   :  { %v1739_v30 = vadd.f32 %v1738_v28, %v1722_v29  ;;  %v1724_v32 = vpop.f32.mrb[65].mxu0 }
 0x54d   :  { %v1740_v33 = vadd.f32 %v1738_v28, %v1724_v32  ;;  %v1726_v36 = vpop.f32.mrb[66].mxu0 }
 0x54e   :  { %v1727_v37 = vpop.f32.mrb[67].mxu0 }
 0x54f   :  { %v1743_v39 = vcombine.low %v1739_v30, %v1740_v33 }
 0x551   :  { %v1750_v41 = vrot.slane %v1743_v39, %v1749_v35 }
 0x553   :  { %v1757_v44 = vrot.slane %v1750_v41, %v1749_v35 }
 0x555   :  { %1763 = vst.msk [vmem:[#allocation3] sm:$0x3] %vm1761_vm1, %v1757_v44 }
 0x556   :  { %1876 = shalt.err (!%p1873_p4)
}
 0x557   :  { %s1877_s30 = scalar_lea.hbm %s2411_s11, 32 }
 0x558   :  { %p1878_p5 = scmp.ne.s32.totalorder %s2411_s11, %s1877_s30  ;;  %p1881_p6 = scmp.lt.u32.totalorder %s1877_s30, %s2411_s11 }
 0x55a   :  { %p1883_p7 = pnand %p1881_p6, %p1878_p5 }
 0x55c   :  { %1886 = shalt.err (!%p1883_p7)
}
 0x55d   :  { %1773 = dma.vmem_to_hbm [thread:$0]  %s1771_s1, 32, %s2411_s11, [#allocation4]  }
 0x55e   :  { %1887 = dma.done.wait [#allocation4], 32  }
 0x55f   :  { %1888 = vsyncadd [#allocation4], 4294967264 }
 0x560   :  { %1777 = vsyncpa [#allocation4], 1 }

</bundles_post_ra>
